<compile_context>
chip_gen: v6e
topology: v6e:2x2x1
jax: 0.10.0
libtpu: 0.0.40
codegen_flags: <defaults>
</compile_context>

<pallas_src>
import functools

import jax
import jax.numpy as jnp
from jax.experimental import pallas as pl
from jax.experimental.pallas import tpu as pltpu


def _round_up(x, m):
    return (x + m - 1) // m * m


def _cdiv(a, b):
    return (a + b - 1) // b


def _pick_vmem_limit():
    """Generation-dependent scoped-VMEM budget (v7x: 64 MiB, v5e/v6e: 128)."""
    try:
        phys = pltpu.get_tpu_info().vmem_capacity_bytes
    except Exception:
        phys = 64 << 20              # conservative default (v7x per-core VMEM)
    return min(int(phys * 3 // 4), 112 << 20)


def _pick_tile_mp(mp_needed, n_batch, k_dim, cin_pad, cout, s, halo,
                  vmem_limit):
    """Largest 128-multiple column tile that fits the VMEM budget, then shrunk
    until the grid has >= 4 steps (pipelining / both v7x TensorCores)."""
    budget = int(vmem_limit * 0.6)                     # headroom for compiler
    per_col = (k_dim * 2                               # bf16 im2col scratch
               + 2 * cout * 4                          # f32 y block (x2 bufs)
               + 2 * 4                                 # f32 mask   (x2 bufs)
               + 2 * s * cin_pad * 2)                  # bf16 x win (x2 bufs)
    fixed = (2 * cout * k_dim * 2                      # weights (x2 bufs)
             + 2 * s * cin_pad * _round_up(halo, 128) * 2
             + (64 << 10))
    tile = (max(budget - fixed, 0) // per_col) // 128 * 128
    tile = max(128, min(tile, 2048, _round_up(mp_needed, 128)))
    while tile > 128 and n_batch * _cdiv(mp_needed, tile) < 4:
        tile = max(128, (tile // 2) // 128 * 128)
    return tile


# ----------------------------------------------------------------------------
# Kernel 1: 3x3x3 conv (+ bias) for one (batch, column-tile) block as a single
# im2col matmul, plus per-channel sum / sum-of-squares for the fused BN.
#
#   x_ref     : (1, 1, S, Cp, Wl)   bf16 polyphase-split, pre-windowed input
#   w_ref     : (Cout, K)           bf16 packed weights, K = 27*Cp
#   b_ref     : (Cout, 1)           f32 conv bias
#   m_ref     : (1, Tm)             f32 validity mask for this column tile
#   y_ref     : (1, Cout, Tm)       f32 conv+bias output (lane-dense)
#   stat_ref  : (1, 1, Cout, 2)     per-tile [sum, sum_sq] over valid columns
#   patch_ref : (K, Tm)             bf16 im2col scratch
# ----------------------------------------------------------------------------
def conv3d_kernel(x_ref, w_ref, b_ref, m_ref, y_ref, stat_ref, patch_ref, *,
                  stride, hp, wp):
    cinp = x_ref.shape[3]
    _, tile_mp = patch_ref.shape

    # im2col: every tap is a STATIC, unit-stride lane slice of the windowed
    # (and, for stride>1, polyphase-split) input block, stored at a sublane-
    # aligned row offset (cinp is a multiple of 16 for bf16), so both sides
    # are full, unmasked vector copies.  All K rows are written every step,
    # so no zero-fill is needed.
    # TODO(synk): for Cin >= ~64 skip im2col and accumulate 27 tap matmuls
    # directly into an f32 VMEM accumulator instead.
    for kd in range(3):
        for kh in range(3):
            for kw in range(3):
                t = (kd * 3 + kh) * 3 + kw
                base = (kd * hp + kh) * wp + kw
                r, q = base % stride, base // stride
                patch_ref[t * cinp:(t + 1) * cinp, :] = (
                    x_ref[0, 0, r, :, q:q + tile_mp])

    # One lane-dense MXU matmul: (Cout, K) @ (K, Tm) -> (Cout, Tm), f32 acc.
    out = jnp.dot(w_ref[...], patch_ref[...],
                  preferred_element_type=jnp.float32)
    out = out + b_ref[...]

    # Per-tile statistics over valid columns only (masked product reused).
    valid = m_ref[...]                                  # (1, Tm)
    masked = out * valid
    stat_ref[0, 0, :, 0:1] = jnp.sum(masked, axis=1, keepdims=True)
    stat_ref[0, 0, :, 1:2] = jnp.sum(masked * out, axis=1, keepdims=True)

    y_ref[0] = out                                      # unmasked, lane-dense


# ----------------------------------------------------------------------------
# Kernel 2: BatchNorm3d (training-mode batch statistics, biased variance) +
# affine + ReLU, single pass over y, in-place via input_output_aliases.
# TODO(synk): variance is single-pass E[x^2]-mean^2 in f32; switch to a
# Welford-style combine if conv outputs are far from zero-mean.
# ----------------------------------------------------------------------------
def bn_relu_kernel(y_ref, stat_ref, gamma_ref, beta_ref, o_ref, *, eps, count):
    tot = jnp.sum(stat_ref[...], axis=0)                # (Cout, 2)
    inv_n = 1.0 / count
    mean = tot[:, 0:1] * inv_n                          # (Cout, 1)
    var = tot[:, 1:2] * inv_n - mean * mean             # biased (PyTorch train)
    scale = gamma_ref[...] * jax.lax.rsqrt(var + eps)
    shift = beta_ref[...] - mean * scale
    o_ref[0] = jnp.maximum(y_ref[0] * scale + shift, 0.0)


# ----------------------------------------------------------------------------
# Wrapper.
# ----------------------------------------------------------------------------
def conv3d_bn_relu(x, weight, bias, gamma, beta, *, stride, padding, eps=1e-5):
    N, Cin, D, H, W = x.shape
    Cout = weight.shape[0]
    p, s = padding, stride
    Dp, Hp, Wp = D + 2 * p, H + 2 * p, W + 2 * p
    Do, Ho, Wo = (Dp - 3) // s + 1, (Hp - 3) // s + 1, (Wp - 3) // s + 1

    cin_pad = _round_up(Cin, 16)        # bf16 sublane packing for tap rows
    K = 27 * cin_pad                    # contraction dim (no pad to 128)
    mp_needed = Do * Hp * Wp            # flattened output column space
    base_max = (2 * Hp + 2) * Wp + 2    # largest tap offset
    halo = base_max // s

    vmem_limit = _pick_vmem_limit()
    tile_mp = _pick_tile_mp(mp_needed, N, K, cin_pad, Cout, s, halo,
                            vmem_limit)
    n_tiles = _cdiv(mp_needed, tile_mp)
    mp_total = n_tiles * tile_mp
    w_len = _round_up(halo + tile_mp, 128)              # per-tile window width
    lp = max((n_tiles - 1) * tile_mp + w_len, _cdiv(Dp * Hp * Wp, s) + 1)

    # Input prep (bf16, channel pad, spatial pad, polyphase split for stride>1,
    # overlapping per-tile column windows so all in-kernel slices are static).
    # TODO(synk): fold these XLA prep passes into the kernel (masked border
    # taps / manual halo DMA) to avoid the extra HBM passes over the input.
    xb = x.astype(jnp.bfloat16)
    xb = jnp.pad(xb, ((0, 0), (0, cin_pad - Cin), (p, p), (p, p), (p, p)))
    x_flat = xb.reshape(N, cin_pad, Dp * Hp * Wp)
    x_flat = jnp.pad(x_flat, ((0, 0), (0, 0), (0, s * lp - Dp * Hp * Wp)))
    x_ph = x_flat.reshape(N, cin_pad, lp, s).transpose(0, 3, 1, 2)  # N,S,Cp,lp
    win_idx = (jnp.arange(n_tiles) * tile_mp)[:, None] + jnp.arange(w_len)
    x_win = jnp.take(x_ph, win_idx, axis=3)             # (N, S, Cp, nT, Wl)
    x_win = jnp.moveaxis(x_win, 3, 1)                   # (N, nT, S, Cp, Wl)

    # (Cout, Cin, 3,3,3) -> (Cout, 27*Cin_pad), rows ordered (kd, kh, kw, cin),
    # zero rows for the padded channels, staged in bf16.
    w_t = jnp.transpose(weight, (0, 2, 3, 4, 1))
    w_t = jnp.pad(w_t, ((0, 0), (0, 0), (0, 0), (0, 0), (0, cin_pad - Cin)))
    w_p = w_t.reshape(Cout, K).astype(jnp.bfloat16)
    b2 = bias.reshape(Cout, 1).astype(jnp.float32)

    # Validity mask over the padded output column space.
    ids = jnp.arange(mp_total, dtype=jnp.int32)
    valid = ((ids < mp_needed)
             & ((ids // Wp) % Hp < Ho)
             & (ids % Wp < Wo)).astype(jnp.float32).reshape(1, mp_total)

    conv = functools.partial(conv3d_kernel, stride=s, hp=Hp, wp=Wp)
    y, stats = pl.pallas_call(
        conv,
        out_shape=(jax.ShapeDtypeStruct((N, Cout, mp_total), jnp.float32),
                   jax.ShapeDtypeStruct((N, n_tiles, Cout, 2), jnp.float32)),
        grid=(N, n_tiles),
        in_specs=[
            pl.BlockSpec((1, 1, s, cin_pad, w_len),
                         lambda n, m: (n, m, 0, 0, 0)),
            pl.BlockSpec((Cout, K), lambda n, m: (0, 0)),
            pl.BlockSpec((Cout, 1), lambda n, m: (0, 0)),
            pl.BlockSpec((1, tile_mp), lambda n, m: (0, m)),
        ],
        out_specs=(
            pl.BlockSpec((1, Cout, tile_mp), lambda n, m: (n, 0, m)),
            pl.BlockSpec((1, 1, Cout, 2), lambda n, m: (n, m, 0, 0)),
        ),
        scratch_shapes=[pltpu.VMEM((K, tile_mp), jnp.bfloat16)],
        compiler_params=pltpu.CompilerParams(
            dimension_semantics=("parallel", "parallel"),
            vmem_limit_bytes=vmem_limit),
    )(x_win, w_p, b2, valid)

    stats_rs = stats.reshape(N * n_tiles, Cout, 2)
    bn = functools.partial(bn_relu_kernel, eps=eps,
                           count=float(N * Do * Ho * Wo))
    out_p = pl.pallas_call(
        bn,
        out_shape=jax.ShapeDtypeStruct((N, Cout, mp_total), jnp.float32),
        grid=(N, n_tiles),
        in_specs=[
            pl.BlockSpec((1, Cout, tile_mp), lambda n, m: (n, 0, m)),
            pl.BlockSpec((N * n_tiles, Cout, 2), lambda n, m: (0, 0, 0)),
            pl.BlockSpec((Cout, 1), lambda n, m: (0, 0)),
            pl.BlockSpec((Cout, 1), lambda n, m: (0, 0)),
        ],
        out_specs=pl.BlockSpec((1, Cout, tile_mp), lambda n, m: (n, 0, m)),
        input_output_aliases={0: 0},          # normalize y in place
        compiler_params=pltpu.CompilerParams(
            dimension_semantics=("parallel", "parallel"),
            vmem_limit_bytes=vmem_limit),
    )(y, stats_rs, gamma.reshape(Cout, 1).astype(jnp.float32),
      beta.reshape(Cout, 1).astype(jnp.float32))

    # Drop the scratch output columns and restore NCDHW.
    # TODO(synk): fold this strided crop into the BN kernel's output layout
    # (or emit bf16 y) to remove the extra HBM pass over the output.
    out = out_p[:, :, :mp_needed].reshape(N, Cout, Do, Hp, Wp)
    return out[:, :, :, :Ho, :Wo]


# ----------------------------------------------------------------------------
# Pure-JAX f32 reference (fresh PyTorch module in train() mode).
# ----------------------------------------------------------------------------
def reference(x, weight, bias, gamma, beta, *, stride, padding, eps=1e-5):
    y = jax.lax.conv_general_dilated(
        x, weight, window_strides=(stride,) * 3,
        padding=[(padding, padding)] * 3,
        dimension_numbers=("NCDHW", "OIDHW", "NCDHW"))
    y = y + bias[None, :, None, None, None]
    mean = y.mean(axis=(0, 2, 3, 4), keepdims=True)
    var = ((y - mean) ** 2).mean(axis=(0, 2, 3, 4), keepdims=True)
    y = (y - mean) * jax.lax.rsqrt(var + eps)
    y = y * gamma[None, :, None, None, None] + beta[None, :, None, None, None]
    return jnp.maximum(y, 0.0)


if __name__ == "__main__":
    # Small deterministic setup: inplanes=4, planes=8, spatial 8^3.
    N, Cin, D, H, W = 2, 4, 8, 8, 8
    Cout = 8

    key = jax.random.PRNGKey(0)
    kx, kw, kb = jax.random.split(key, 3)

    x = jax.random.normal(kx, (N, Cin, D, H, W), jnp.float32)
    fan_in = Cin * 3 * 3 * 3
    bound = 1.0 / jnp.sqrt(jnp.float32(fan_in))
    weight = jax.random.uniform(kw, (Cout, Cin, 3, 3, 3), jnp.float32,
                                -bound, bound)
    bias = jax.random.uniform(kb, (Cout,), jnp.float32, -bound, bound)
    gamma = jnp.ones((Cout,), jnp.float32)     # BatchNorm3d default affine
    beta = jnp.zeros((Cout,), jnp.float32)
    # TODO(synk): running_mean/running_var buffer updates (training-time side
    # effect) are not modeled; they do not affect the forward output.

    # Exercise both the stride=1 path and the polyphase stride=2 path.
    for stride, padding in ((1, 1), (2, 1)):
        out = conv3d_bn_relu(x, weight, bias, gamma, beta,
                             stride=stride, padding=padding)
        out = jax.block_until_ready(out)
        ref = reference(x, weight, bias, gamma, beta,
                        stride=stride, padding=padding)
        assert out.shape == ref.shape, (out.shape, ref.shape)
        err = float(jnp.max(jnp.abs(out - ref)))
        # bf16 MXU staging with f32 accumulation vs a pure-f32 reference:
        # expected max error ~5e-3 on unit-scale outputs; layout/indexing bugs
        # would show up as O(1) errors.
        assert err < 2e-2, err

    print("KERNEL_OK")
</pallas_src>

<mosaic_0001>
module attributes {stable_mosaic.version = 11 : i64} {
  func.func @conv3d_kernel(%arg0: i32, %arg1: i32, %arg2: memref<1x1x1x16x640xbf16, #tpu.memory_space<vmem>>, %arg3: memref<8x432xbf16, #tpu.memory_space<vmem>>, %arg4: memref<8x1xf32, #tpu.memory_space<vmem>>, %arg5: memref<1x384xf32, #tpu.memory_space<vmem>>, %arg6: memref<1x8x384xf32, #tpu.memory_space<vmem>>, %arg7: memref<1x1x8x2xf32, #tpu.memory_space<vmem>>, %arg8: memref<432x384xbf16, #tpu.memory_space<vmem>>) attributes {dimension_semantics = [#tpu.dimension_semantics<parallel>, #tpu.dimension_semantics<parallel>], iteration_bounds = array<i64: 2, 3>, scalar_prefetch = 0 : i64, scratch_operands = 1 : i64, tpu.core_type = #tpu.core_type<tc>, window_params = [{transform_indices = @transform_0, window_bounds = array<i64: 1, 1, 1, 16, 640>}, {pipeline_mode = #tpu.pipeline_mode<synchronous>, transform_indices = @transform_1, window_bounds = array<i64: 8, 432>}, {pipeline_mode = #tpu.pipeline_mode<synchronous>, transform_indices = @transform_2, window_bounds = array<i64: 8, 1>}, {transform_indices = @transform_3, window_bounds = array<i64: 1, 384>}, {transform_indices = @transform_4, window_bounds = array<i64: 1, 8, 384>}, {transform_indices = @transform_5, window_bounds = array<i64: 1, 1, 8, 2>}]} {
    %c0 = arith.constant 0 : index
    %c0_0 = arith.constant 0 : index
    %c0_1 = arith.constant 0 : index
    %c0_2 = arith.constant 0 : index
    %c0_3 = arith.constant 0 : index
    %0 = vector.load %arg2[%c0, %c0_0, %c0_1, %c0_2, %c0_3] : memref<1x1x1x16x640xbf16, #tpu.memory_space<vmem>>, vector<1x1x1x16x384xbf16>
    %1 = vector.shape_cast %0 : vector<1x1x1x16x384xbf16> to vector<16x384xbf16>
    %c0_4 = arith.constant 0 : index
    %c0_5 = arith.constant 0 : index
    %2 = vector.load %arg8[%c0_4, %c0_5] : memref<432x384xbf16, #tpu.memory_space<vmem>>, vector<16x384xbf16>
    tpu.vector_store %arg8[%c0_4, %c0_5], %1 {strides = array<i32>} : memref<432x384xbf16, #tpu.memory_space<vmem>>, vector<16x384xbf16>,
    %c0_6 = arith.constant 0 : index
    %c0_7 = arith.constant 0 : index
    %c0_8 = arith.constant 0 : index
    %c0_9 = arith.constant 0 : index
    %c1 = arith.constant 1 : index
    %3 = vector.load %arg2[%c0_6, %c0_7, %c0_8, %c0_9, %c1] : memref<1x1x1x16x640xbf16, #tpu.memory_space<vmem>>, vector<1x1x1x16x384xbf16>
    %4 = vector.shape_cast %3 : vector<1x1x1x16x384xbf16> to vector<16x384xbf16>
    %c16 = arith.constant 16 : index
    %c0_10 = arith.constant 0 : index
    %5 = vector.load %arg8[%c16, %c0_10] : memref<432x384xbf16, #tpu.memory_space<vmem>>, vector<16x384xbf16>
    tpu.vector_store %arg8[%c16, %c0_10], %4 {strides = array<i32>} : memref<432x384xbf16, #tpu.memory_space<vmem>>, vector<16x384xbf16>,
    %c0_11 = arith.constant 0 : index
    %c0_12 = arith.constant 0 : index
    %c0_13 = arith.constant 0 : index
    %c0_14 = arith.constant 0 : index
    %c2 = arith.constant 2 : index
    %6 = vector.load %arg2[%c0_11, %c0_12, %c0_13, %c0_14, %c2] : memref<1x1x1x16x640xbf16, #tpu.memory_space<vmem>>, vector<1x1x1x16x384xbf16>
    %7 = vector.shape_cast %6 : vector<1x1x1x16x384xbf16> to vector<16x384xbf16>
    %c32 = arith.constant 32 : index
    %c0_15 = arith.constant 0 : index
    %8 = vector.load %arg8[%c32, %c0_15] : memref<432x384xbf16, #tpu.memory_space<vmem>>, vector<16x384xbf16>
    tpu.vector_store %arg8[%c32, %c0_15], %7 {strides = array<i32>} : memref<432x384xbf16, #tpu.memory_space<vmem>>, vector<16x384xbf16>,
    %c0_16 = arith.constant 0 : index
    %c0_17 = arith.constant 0 : index
    %c0_18 = arith.constant 0 : index
    %c0_19 = arith.constant 0 : index
    %c10 = arith.constant 10 : index
    %9 = vector.load %arg2[%c0_16, %c0_17, %c0_18, %c0_19, %c10] : memref<1x1x1x16x640xbf16, #tpu.memory_space<vmem>>, vector<1x1x1x16x384xbf16>
    %10 = vector.shape_cast %9 : vector<1x1x1x16x384xbf16> to vector<16x384xbf16>
    %c48 = arith.constant 48 : index
    %c0_20 = arith.constant 0 : index
    %11 = vector.load %arg8[%c48, %c0_20] : memref<432x384xbf16, #tpu.memory_space<vmem>>, vector<16x384xbf16>
    tpu.vector_store %arg8[%c48, %c0_20], %10 {strides = array<i32>} : memref<432x384xbf16, #tpu.memory_space<vmem>>, vector<16x384xbf16>,
    %c0_21 = arith.constant 0 : index
    %c0_22 = arith.constant 0 : index
    %c0_23 = arith.constant 0 : index
    %c0_24 = arith.constant 0 : index
    %c11 = arith.constant 11 : index
    %12 = vector.load %arg2[%c0_21, %c0_22, %c0_23, %c0_24, %c11] : memref<1x1x1x16x640xbf16, #tpu.memory_space<vmem>>, vector<1x1x1x16x384xbf16>
    %13 = vector.shape_cast %12 : vector<1x1x1x16x384xbf16> to vector<16x384xbf16>
    %c64 = arith.constant 64 : index
    %c0_25 = arith.constant 0 : index
    %14 = vector.load %arg8[%c64, %c0_25] : memref<432x384xbf16, #tpu.memory_space<vmem>>, vector<16x384xbf16>
    tpu.vector_store %arg8[%c64, %c0_25], %13 {strides = array<i32>} : memref<432x384xbf16, #tpu.memory_space<vmem>>, vector<16x384xbf16>,
    %c0_26 = arith.constant 0 : index
    %c0_27 = arith.constant 0 : index
    %c0_28 = arith.constant 0 : index
    %c0_29 = arith.constant 0 : index
    %c12 = arith.constant 12 : index
    %15 = vector.load %arg2[%c0_26, %c0_27, %c0_28, %c0_29, %c12] : memref<1x1x1x16x640xbf16, #tpu.memory_space<vmem>>, vector<1x1x1x16x384xbf16>
    %16 = vector.shape_cast %15 : vector<1x1x1x16x384xbf16> to vector<16x384xbf16>
    %c80 = arith.constant 80 : index
    %c0_30 = arith.constant 0 : index
    %17 = vector.load %arg8[%c80, %c0_30] : memref<432x384xbf16, #tpu.memory_space<vmem>>, vector<16x384xbf16>
    tpu.vector_store %arg8[%c80, %c0_30], %16 {strides = array<i32>} : memref<432x384xbf16, #tpu.memory_space<vmem>>, vector<16x384xbf16>,
    %c0_31 = arith.constant 0 : index
    %c0_32 = arith.constant 0 : index
    %c0_33 = arith.constant 0 : index
    %c0_34 = arith.constant 0 : index
    %c20 = arith.constant 20 : index
    %18 = vector.load %arg2[%c0_31, %c0_32, %c0_33, %c0_34, %c20] : memref<1x1x1x16x640xbf16, #tpu.memory_space<vmem>>, vector<1x1x1x16x384xbf16>
    %19 = vector.shape_cast %18 : vector<1x1x1x16x384xbf16> to vector<16x384xbf16>
    %c96 = arith.constant 96 : index
    %c0_35 = arith.constant 0 : index
    %20 = vector.load %arg8[%c96, %c0_35] : memref<432x384xbf16, #tpu.memory_space<vmem>>, vector<16x384xbf16>
    tpu.vector_store %arg8[%c96, %c0_35], %19 {strides = array<i32>} : memref<432x384xbf16, #tpu.memory_space<vmem>>, vector<16x384xbf16>,
    %c0_36 = arith.constant 0 : index
    %c0_37 = arith.constant 0 : index
    %c0_38 = arith.constant 0 : index
    %c0_39 = arith.constant 0 : index
    %c21 = arith.constant 21 : index
    %21 = vector.load %arg2[%c0_36, %c0_37, %c0_38, %c0_39, %c21] : memref<1x1x1x16x640xbf16, #tpu.memory_space<vmem>>, vector<1x1x1x16x384xbf16>
    %22 = vector.shape_cast %21 : vector<1x1x1x16x384xbf16> to vector<16x384xbf16>
    %c112 = arith.constant 112 : index
    %c0_40 = arith.constant 0 : index
    %23 = vector.load %arg8[%c112, %c0_40] : memref<432x384xbf16, #tpu.memory_space<vmem>>, vector<16x384xbf16>
    tpu.vector_store %arg8[%c112, %c0_40], %22 {strides = array<i32>} : memref<432x384xbf16, #tpu.memory_space<vmem>>, vector<16x384xbf16>,
    %c0_41 = arith.constant 0 : index
    %c0_42 = arith.constant 0 : index
    %c0_43 = arith.constant 0 : index
    %c0_44 = arith.constant 0 : index
    %c22 = arith.constant 22 : index
    %24 = vector.load %arg2[%c0_41, %c0_42, %c0_43, %c0_44, %c22] : memref<1x1x1x16x640xbf16, #tpu.memory_space<vmem>>, vector<1x1x1x16x384xbf16>
    %25 = vector.shape_cast %24 : vector<1x1x1x16x384xbf16> to vector<16x384xbf16>
    %c128 = arith.constant 128 : index
    %c0_45 = arith.constant 0 : index
    %26 = vector.load %arg8[%c128, %c0_45] : memref<432x384xbf16, #tpu.memory_space<vmem>>, vector<16x384xbf16>
    tpu.vector_store %arg8[%c128, %c0_45], %25 {strides = array<i32>} : memref<432x384xbf16, #tpu.memory_space<vmem>>, vector<16x384xbf16>,
    %c0_46 = arith.constant 0 : index
    %c0_47 = arith.constant 0 : index
    %c0_48 = arith.constant 0 : index
    %c0_49 = arith.constant 0 : index
    %c100 = arith.constant 100 : index
    %27 = vector.load %arg2[%c0_46, %c0_47, %c0_48, %c0_49, %c100] : memref<1x1x1x16x640xbf16, #tpu.memory_space<vmem>>, vector<1x1x1x16x384xbf16>
    %28 = vector.shape_cast %27 : vector<1x1x1x16x384xbf16> to vector<16x384xbf16>
    %c144 = arith.constant 144 : index
    %c0_50 = arith.constant 0 : index
    %29 = vector.load %arg8[%c144, %c0_50] : memref<432x384xbf16, #tpu.memory_space<vmem>>, vector<16x384xbf16>
    tpu.vector_store %arg8[%c144, %c0_50], %28 {strides = array<i32>} : memref<432x384xbf16, #tpu.memory_space<vmem>>, vector<16x384xbf16>,
    %c0_51 = arith.constant 0 : index
    %c0_52 = arith.constant 0 : index
    %c0_53 = arith.constant 0 : index
    %c0_54 = arith.constant 0 : index
    %c101 = arith.constant 101 : index
    %30 = vector.load %arg2[%c0_51, %c0_52, %c0_53, %c0_54, %c101] : memref<1x1x1x16x640xbf16, #tpu.memory_space<vmem>>, vector<1x1x1x16x384xbf16>
    %31 = vector.shape_cast %30 : vector<1x1x1x16x384xbf16> to vector<16x384xbf16>
    %c160 = arith.constant 160 : index
    %c0_55 = arith.constant 0 : index
    %32 = vector.load %arg8[%c160, %c0_55] : memref<432x384xbf16, #tpu.memory_space<vmem>>, vector<16x384xbf16>
    tpu.vector_store %arg8[%c160, %c0_55], %31 {strides = array<i32>} : memref<432x384xbf16, #tpu.memory_space<vmem>>, vector<16x384xbf16>,
    %c0_56 = arith.constant 0 : index
    %c0_57 = arith.constant 0 : index
    %c0_58 = arith.constant 0 : index
    %c0_59 = arith.constant 0 : index
    %c102 = arith.constant 102 : index
    %33 = vector.load %arg2[%c0_56, %c0_57, %c0_58, %c0_59, %c102] : memref<1x1x1x16x640xbf16, #tpu.memory_space<vmem>>, vector<1x1x1x16x384xbf16>
    %34 = vector.shape_cast %33 : vector<1x1x1x16x384xbf16> to vector<16x384xbf16>
    %c176 = arith.constant 176 : index
    %c0_60 = arith.constant 0 : index
    %35 = vector.load %arg8[%c176, %c0_60] : memref<432x384xbf16, #tpu.memory_space<vmem>>, vector<16x384xbf16>
    tpu.vector_store %arg8[%c176, %c0_60], %34 {strides = array<i32>} : memref<432x384xbf16, #tpu.memory_space<vmem>>, vector<16x384xbf16>,
    %c0_61 = arith.constant 0 : index
    %c0_62 = arith.constant 0 : index
    %c0_63 = arith.constant 0 : index
    %c0_64 = arith.constant 0 : index
    %c110 = arith.constant 110 : index
    %36 = vector.load %arg2[%c0_61, %c0_62, %c0_63, %c0_64, %c110] : memref<1x1x1x16x640xbf16, #tpu.memory_space<vmem>>, vector<1x1x1x16x384xbf16>
    %37 = vector.shape_cast %36 : vector<1x1x1x16x384xbf16> to vector<16x384xbf16>
    %c192 = arith.constant 192 : index
    %c0_65 = arith.constant 0 : index
    %38 = vector.load %arg8[%c192, %c0_65] : memref<432x384xbf16, #tpu.memory_space<vmem>>, vector<16x384xbf16>
    tpu.vector_store %arg8[%c192, %c0_65], %37 {strides = array<i32>} : memref<432x384xbf16, #tpu.memory_space<vmem>>, vector<16x384xbf16>,
    %c0_66 = arith.constant 0 : index
    %c0_67 = arith.constant 0 : index
    %c0_68 = arith.constant 0 : index
    %c0_69 = arith.constant 0 : index
    %c111 = arith.constant 111 : index
    %39 = vector.load %arg2[%c0_66, %c0_67, %c0_68, %c0_69, %c111] : memref<1x1x1x16x640xbf16, #tpu.memory_space<vmem>>, vector<1x1x1x16x384xbf16>
    %40 = vector.shape_cast %39 : vector<1x1x1x16x384xbf16> to vector<16x384xbf16>
    %c208 = arith.constant 208 : index
    %c0_70 = arith.constant 0 : index
    %41 = vector.load %arg8[%c208, %c0_70] : memref<432x384xbf16, #tpu.memory_space<vmem>>, vector<16x384xbf16>
    tpu.vector_store %arg8[%c208, %c0_70], %40 {strides = array<i32>} : memref<432x384xbf16, #tpu.memory_space<vmem>>, vector<16x384xbf16>,
    %c0_71 = arith.constant 0 : index
    %c0_72 = arith.constant 0 : index
    %c0_73 = arith.constant 0 : index
    %c0_74 = arith.constant 0 : index
    %c112_75 = arith.constant 112 : index
    %42 = vector.load %arg2[%c0_71, %c0_72, %c0_73, %c0_74, %c112_75] : memref<1x1x1x16x640xbf16, #tpu.memory_space<vmem>>, vector<1x1x1x16x384xbf16>
    %43 = vector.shape_cast %42 : vector<1x1x1x16x384xbf16> to vector<16x384xbf16>
    %c224 = arith.constant 224 : index
    %c0_76 = arith.constant 0 : index
    %44 = vector.load %arg8[%c224, %c0_76] : memref<432x384xbf16, #tpu.memory_space<vmem>>, vector<16x384xbf16>
    tpu.vector_store %arg8[%c224, %c0_76], %43 {strides = array<i32>} : memref<432x384xbf16, #tpu.memory_space<vmem>>, vector<16x384xbf16>,
    %c0_77 = arith.constant 0 : index
    %c0_78 = arith.constant 0 : index
    %c0_79 = arith.constant 0 : index
    %c0_80 = arith.constant 0 : index
    %c120 = arith.constant 120 : index
    %45 = vector.load %arg2[%c0_77, %c0_78, %c0_79, %c0_80, %c120] : memref<1x1x1x16x640xbf16, #tpu.memory_space<vmem>>, vector<1x1x1x16x384xbf16>
    %46 = vector.shape_cast %45 : vector<1x1x1x16x384xbf16> to vector<16x384xbf16>
    %c240 = arith.constant 240 : index
    %c0_81 = arith.constant 0 : index
    %47 = vector.load %arg8[%c240, %c0_81] : memref<432x384xbf16, #tpu.memory_space<vmem>>, vector<16x384xbf16>
    tpu.vector_store %arg8[%c240, %c0_81], %46 {strides = array<i32>} : memref<432x384xbf16, #tpu.memory_space<vmem>>, vector<16x384xbf16>,
    %c0_82 = arith.constant 0 : index
    %c0_83 = arith.constant 0 : index
    %c0_84 = arith.constant 0 : index
    %c0_85 = arith.constant 0 : index
    %c121 = arith.constant 121 : index
    %48 = vector.load %arg2[%c0_82, %c0_83, %c0_84, %c0_85, %c121] : memref<1x1x1x16x640xbf16, #tpu.memory_space<vmem>>, vector<1x1x1x16x384xbf16>
    %49 = vector.shape_cast %48 : vector<1x1x1x16x384xbf16> to vector<16x384xbf16>
    %c256 = arith.constant 256 : index
    %c0_86 = arith.constant 0 : index
    %50 = vector.load %arg8[%c256, %c0_86] : memref<432x384xbf16, #tpu.memory_space<vmem>>, vector<16x384xbf16>
    tpu.vector_store %arg8[%c256, %c0_86], %49 {strides = array<i32>} : memref<432x384xbf16, #tpu.memory_space<vmem>>, vector<16x384xbf16>,
    %c0_87 = arith.constant 0 : index
    %c0_88 = arith.constant 0 : index
    %c0_89 = arith.constant 0 : index
    %c0_90 = arith.constant 0 : index
    %c122 = arith.constant 122 : index
    %51 = vector.load %arg2[%c0_87, %c0_88, %c0_89, %c0_90, %c122] : memref<1x1x1x16x640xbf16, #tpu.memory_space<vmem>>, vector<1x1x1x16x384xbf16>
    %52 = vector.shape_cast %51 : vector<1x1x1x16x384xbf16> to vector<16x384xbf16>
    %c272 = arith.constant 272 : index
    %c0_91 = arith.constant 0 : index
    %53 = vector.load %arg8[%c272, %c0_91] : memref<432x384xbf16, #tpu.memory_space<vmem>>, vector<16x384xbf16>
    tpu.vector_store %arg8[%c272, %c0_91], %52 {strides = array<i32>} : memref<432x384xbf16, #tpu.memory_space<vmem>>, vector<16x384xbf16>,
    %c0_92 = arith.constant 0 : index
    %c0_93 = arith.constant 0 : index
    %c0_94 = arith.constant 0 : index
    %c0_95 = arith.constant 0 : index
    %c200 = arith.constant 200 : index
    %54 = vector.load %arg2[%c0_92, %c0_93, %c0_94, %c0_95, %c200] : memref<1x1x1x16x640xbf16, #tpu.memory_space<vmem>>, vector<1x1x1x16x384xbf16>
    %55 = vector.shape_cast %54 : vector<1x1x1x16x384xbf16> to vector<16x384xbf16>
    %c288 = arith.constant 288 : index
    %c0_96 = arith.constant 0 : index
    %56 = vector.load %arg8[%c288, %c0_96] : memref<432x384xbf16, #tpu.memory_space<vmem>>, vector<16x384xbf16>
    tpu.vector_store %arg8[%c288, %c0_96], %55 {strides = array<i32>} : memref<432x384xbf16, #tpu.memory_space<vmem>>, vector<16x384xbf16>,
    %c0_97 = arith.constant 0 : index
    %c0_98 = arith.constant 0 : index
    %c0_99 = arith.constant 0 : index
    %c0_100 = arith.constant 0 : index
    %c201 = arith.constant 201 : index
    %57 = vector.load %arg2[%c0_97, %c0_98, %c0_99, %c0_100, %c201] : memref<1x1x1x16x640xbf16, #tpu.memory_space<vmem>>, vector<1x1x1x16x384xbf16>
    %58 = vector.shape_cast %57 : vector<1x1x1x16x384xbf16> to vector<16x384xbf16>
    %c304 = arith.constant 304 : index
    %c0_101 = arith.constant 0 : index
    %59 = vector.load %arg8[%c304, %c0_101] : memref<432x384xbf16, #tpu.memory_space<vmem>>, vector<16x384xbf16>
    tpu.vector_store %arg8[%c304, %c0_101], %58 {strides = array<i32>} : memref<432x384xbf16, #tpu.memory_space<vmem>>, vector<16x384xbf16>,
    %c0_102 = arith.constant 0 : index
    %c0_103 = arith.constant 0 : index
    %c0_104 = arith.constant 0 : index
    %c0_105 = arith.constant 0 : index
    %c202 = arith.constant 202 : index
    %60 = vector.load %arg2[%c0_102, %c0_103, %c0_104, %c0_105, %c202] : memref<1x1x1x16x640xbf16, #tpu.memory_space<vmem>>, vector<1x1x1x16x384xbf16>
    %61 = vector.shape_cast %60 : vector<1x1x1x16x384xbf16> to vector<16x384xbf16>
    %c320 = arith.constant 320 : index
    %c0_106 = arith.constant 0 : index
    %62 = vector.load %arg8[%c320, %c0_106] : memref<432x384xbf16, #tpu.memory_space<vmem>>, vector<16x384xbf16>
    tpu.vector_store %arg8[%c320, %c0_106], %61 {strides = array<i32>} : memref<432x384xbf16, #tpu.memory_space<vmem>>, vector<16x384xbf16>,
    %c0_107 = arith.constant 0 : index
    %c0_108 = arith.constant 0 : index
    %c0_109 = arith.constant 0 : index
    %c0_110 = arith.constant 0 : index
    %c210 = arith.constant 210 : index
    %63 = vector.load %arg2[%c0_107, %c0_108, %c0_109, %c0_110, %c210] : memref<1x1x1x16x640xbf16, #tpu.memory_space<vmem>>, vector<1x1x1x16x384xbf16>
    %64 = vector.shape_cast %63 : vector<1x1x1x16x384xbf16> to vector<16x384xbf16>
    %c336 = arith.constant 336 : index
    %c0_111 = arith.constant 0 : index
    %65 = vector.load %arg8[%c336, %c0_111] : memref<432x384xbf16, #tpu.memory_space<vmem>>, vector<16x384xbf16>
    tpu.vector_store %arg8[%c336, %c0_111], %64 {strides = array<i32>} : memref<432x384xbf16, #tpu.memory_space<vmem>>, vector<16x384xbf16>,
    %c0_112 = arith.constant 0 : index
    %c0_113 = arith.constant 0 : index
    %c0_114 = arith.constant 0 : index
    %c0_115 = arith.constant 0 : index
    %c211 = arith.constant 211 : index
    %66 = vector.load %arg2[%c0_112, %c0_113, %c0_114, %c0_115, %c211] : memref<1x1x1x16x640xbf16, #tpu.memory_space<vmem>>, vector<1x1x1x16x384xbf16>
    %67 = vector.shape_cast %66 : vector<1x1x1x16x384xbf16> to vector<16x384xbf16>
    %c352 = arith.constant 352 : index
    %c0_116 = arith.constant 0 : index
    %68 = vector.load %arg8[%c352, %c0_116] : memref<432x384xbf16, #tpu.memory_space<vmem>>, vector<16x384xbf16>
    tpu.vector_store %arg8[%c352, %c0_116], %67 {strides = array<i32>} : memref<432x384xbf16, #tpu.memory_space<vmem>>, vector<16x384xbf16>,
    %c0_117 = arith.constant 0 : index
    %c0_118 = arith.constant 0 : index
    %c0_119 = arith.constant 0 : index
    %c0_120 = arith.constant 0 : index
    %c212 = arith.constant 212 : index
    %69 = vector.load %arg2[%c0_117, %c0_118, %c0_119, %c0_120, %c212] : memref<1x1x1x16x640xbf16, #tpu.memory_space<vmem>>, vector<1x1x1x16x384xbf16>
    %70 = vector.shape_cast %69 : vector<1x1x1x16x384xbf16> to vector<16x384xbf16>
    %c368 = arith.constant 368 : index
    %c0_121 = arith.constant 0 : index
    %71 = vector.load %arg8[%c368, %c0_121] : memref<432x384xbf16, #tpu.memory_space<vmem>>, vector<16x384xbf16>
    tpu.vector_store %arg8[%c368, %c0_121], %70 {strides = array<i32>} : memref<432x384xbf16, #tpu.memory_space<vmem>>, vector<16x384xbf16>,
    %c0_122 = arith.constant 0 : index
    %c0_123 = arith.constant 0 : index
    %c0_124 = arith.constant 0 : index
    %c0_125 = arith.constant 0 : index
    %c220 = arith.constant 220 : index
    %72 = vector.load %arg2[%c0_122, %c0_123, %c0_124, %c0_125, %c220] : memref<1x1x1x16x640xbf16, #tpu.memory_space<vmem>>, vector<1x1x1x16x384xbf16>
    %73 = vector.shape_cast %72 : vector<1x1x1x16x384xbf16> to vector<16x384xbf16>
    %c384 = arith.constant 384 : index
    %c0_126 = arith.constant 0 : index
    %74 = vector.load %arg8[%c384, %c0_126] : memref<432x384xbf16, #tpu.memory_space<vmem>>, vector<16x384xbf16>
    tpu.vector_store %arg8[%c384, %c0_126], %73 {strides = array<i32>} : memref<432x384xbf16, #tpu.memory_space<vmem>>, vector<16x384xbf16>,
    %c0_127 = arith.constant 0 : index
    %c0_128 = arith.constant 0 : index
    %c0_129 = arith.constant 0 : index
    %c0_130 = arith.constant 0 : index
    %c221 = arith.constant 221 : index
    %75 = vector.load %arg2[%c0_127, %c0_128, %c0_129, %c0_130, %c221] : memref<1x1x1x16x640xbf16, #tpu.memory_space<vmem>>, vector<1x1x1x16x384xbf16>
    %76 = vector.shape_cast %75 : vector<1x1x1x16x384xbf16> to vector<16x384xbf16>
    %c400 = arith.constant 400 : index
    %c0_131 = arith.constant 0 : index
    %77 = vector.load %arg8[%c400, %c0_131] : memref<432x384xbf16, #tpu.memory_space<vmem>>, vector<16x384xbf16>
    tpu.vector_store %arg8[%c400, %c0_131], %76 {strides = array<i32>} : memref<432x384xbf16, #tpu.memory_space<vmem>>, vector<16x384xbf16>,
    %c0_132 = arith.constant 0 : index
    %c0_133 = arith.constant 0 : index
    %c0_134 = arith.constant 0 : index
    %c0_135 = arith.constant 0 : index
    %c222 = arith.constant 222 : index
    %78 = vector.load %arg2[%c0_132, %c0_133, %c0_134, %c0_135, %c222] : memref<1x1x1x16x640xbf16, #tpu.memory_space<vmem>>, vector<1x1x1x16x384xbf16>
    %79 = vector.shape_cast %78 : vector<1x1x1x16x384xbf16> to vector<16x384xbf16>
    %c416 = arith.constant 416 : index
    %c0_136 = arith.constant 0 : index
    %80 = vector.load %arg8[%c416, %c0_136] : memref<432x384xbf16, #tpu.memory_space<vmem>>, vector<16x384xbf16>
    tpu.vector_store %arg8[%c416, %c0_136], %79 {strides = array<i32>} : memref<432x384xbf16, #tpu.memory_space<vmem>>, vector<16x384xbf16>,
    %c0_137 = arith.constant 0 : index
    %c0_138 = arith.constant 0 : index
    %81 = vector.load %arg3[%c0_137, %c0_138] : memref<8x432xbf16, #tpu.memory_space<vmem>>, vector<8x432xbf16>
    %c0_139 = arith.constant 0 : index
    %c0_140 = arith.constant 0 : index
    %82 = vector.load %arg8[%c0_139, %c0_140] : memref<432x384xbf16, #tpu.memory_space<vmem>>, vector<432x384xbf16>
    %cst = arith.constant dense<0.000000e+00> : vector<8x384xf32>
    %83 = tpu.matmul %81, %82, %cst {dimension_numbers = #tpu.dot_dimension_numbers<[1], [0], [0], [1], [0, 0, 1, 1], [], []>} : vector<8x432xbf16>, vector<432x384xbf16>, vector<8x384xf32> -> vector<8x384xf32>
    %c0_141 = arith.constant 0 : index
    %c0_142 = arith.constant 0 : index
    %84 = vector.load %arg4[%c0_141, %c0_142] : memref<8x1xf32, #tpu.memory_space<vmem>>, vector<8x1xf32>
    %85 = vector.broadcast %84 : vector<8x1xf32> to vector<8x384xf32>
    %86 = arith.addf %83, %85 : vector<8x384xf32>
    %c0_143 = arith.constant 0 : index
    %c0_144 = arith.constant 0 : index
    %87 = vector.load %arg5[%c0_143, %c0_144] : memref<1x384xf32, #tpu.memory_space<vmem>>, vector<1x384xf32>
    %88 = vector.broadcast %87 : vector<1x384xf32> to vector<8x384xf32>
    %89 = arith.mulf %86, %88 : vector<8x384xf32>
    %cst_145 = arith.constant dense<0.000000e+00> : vector<8xf32>
    %90 = vector.multi_reduction <add>, %89, %cst_145 [1] : vector<8x384xf32> to vector<8xf32>
    %91 = vector.shape_cast %90 : vector<8xf32> to vector<8x1xf32>
    %c0_146 = arith.constant 0 : index
    %c0_147 = arith.constant 0 : index
    %c0_148 = arith.constant 0 : index
    %c0_149 = arith.constant 0 : index
    %92 = vector.load %arg7[%c0_146, %c0_147, %c0_148, %c0_149] : memref<1x1x8x2xf32, #tpu.memory_space<vmem>>, vector<1x1x8x1xf32>
    %93 = vector.shape_cast %92 : vector<1x1x8x1xf32> to vector<8x1xf32>
    %94 = vector.shape_cast %91 : vector<8x1xf32> to vector<1x1x8x1xf32>
    tpu.vector_store %arg7[%c0_146, %c0_147, %c0_148, %c0_149], %94 {strides = array<i32>} : memref<1x1x8x2xf32, #tpu.memory_space<vmem>>, vector<1x1x8x1xf32>,
    %95 = arith.mulf %89, %86 : vector<8x384xf32>
    %cst_150 = arith.constant dense<0.000000e+00> : vector<8xf32>
    %96 = vector.multi_reduction <add>, %95, %cst_150 [1] : vector<8x384xf32> to vector<8xf32>
    %97 = vector.shape_cast %96 : vector<8xf32> to vector<8x1xf32>
    %c0_151 = arith.constant 0 : index
    %c0_152 = arith.constant 0 : index
    %c0_153 = arith.constant 0 : index
    %c1_154 = arith.constant 1 : index
    %98 = vector.load %arg7[%c0_151, %c0_152, %c0_153, %c1_154] : memref<1x1x8x2xf32, #tpu.memory_space<vmem>>, vector<1x1x8x1xf32>
    %99 = vector.shape_cast %98 : vector<1x1x8x1xf32> to vector<8x1xf32>
    %100 = vector.shape_cast %97 : vector<8x1xf32> to vector<1x1x8x1xf32>
    tpu.vector_store %arg7[%c0_151, %c0_152, %c0_153, %c1_154], %100 {strides = array<i32>} : memref<1x1x8x2xf32, #tpu.memory_space<vmem>>, vector<1x1x8x1xf32>,
    %c0_155 = arith.constant 0 : index
    %c0_156 = arith.constant 0 : index
    %c0_157 = arith.constant 0 : index
    %101 = vector.load %arg6[%c0_155, %c0_156, %c0_157] : memref<1x8x384xf32, #tpu.memory_space<vmem>>, vector<1x8x384xf32>
    %102 = vector.shape_cast %101 : vector<1x8x384xf32> to vector<8x384xf32>
    %103 = vector.shape_cast %86 : vector<8x384xf32> to vector<1x8x384xf32>
    tpu.vector_store %arg6[%c0_155, %c0_156, %c0_157], %103 {strides = array<i32>} : memref<1x8x384xf32, #tpu.memory_space<vmem>>, vector<1x8x384xf32>,
    return
  }
  func.func @transform_0(%arg0: i32, %arg1: i32) -> (i32, i32, i32, i32, i32) {
    %c0_i32 = arith.constant 0 : i32
    %c0_i32_0 = arith.constant 0 : i32
    %c0_i32_1 = arith.constant 0 : i32
    %c0_i32_2 = arith.constant 0 : i32
    return %arg0, %arg1, %c0_i32, %c0_i32_0, %c0_i32_1 : i32, i32, i32, i32, i32
  }
  func.func @transform_1(%arg0: i32, %arg1: i32) -> (i32, i32) {
    %c0_i32 = arith.constant 0 : i32
    %c0_i32_0 = arith.constant 0 : i32
    %c0_i32_1 = arith.constant 0 : i32
    return %c0_i32, %c0_i32_0 : i32, i32
  }
  func.func @transform_2(%arg0: i32, %arg1: i32) -> (i32, i32) {
    %c0_i32 = arith.constant 0 : i32
    %c0_i32_0 = arith.constant 0 : i32
    %c0_i32_1 = arith.constant 0 : i32
    return %c0_i32, %c0_i32_0 : i32, i32
  }
  func.func @transform_3(%arg0: i32, %arg1: i32) -> (i32, i32) {
    %c0_i32 = arith.constant 0 : i32
    %c0_i32_0 = arith.constant 0 : i32
    return %c0_i32, %arg1 : i32, i32
  }
  func.func @transform_4(%arg0: i32, %arg1: i32) -> (i32, i32, i32) {
    %c0_i32 = arith.constant 0 : i32
    %c0_i32_0 = arith.constant 0 : i32
    return %arg0, %c0_i32, %arg1 : i32, i32, i32
  }
  func.func @transform_5(%arg0: i32, %arg1: i32) -> (i32, i32, i32, i32) {
    %c0_i32 = arith.constant 0 : i32
    %c0_i32_0 = arith.constant 0 : i32
    %c0_i32_1 = arith.constant 0 : i32
    return %arg0, %arg1, %c0_i32, %c0_i32_0 : i32, i32, i32, i32
  }
}

</mosaic_0001>

<bundles_post_ra>
// kernel: tpu_custom_call.1
= control target key start
LH: loop header
LB: loop body
LE: loop exit
PB: predicated region body
PF: predicated region fallthrough
CT: control target
= control target key end

     0   :  { %s3200_s0 = inlined_call_operand.hbm [shape: bf16[2,3,1,16,640], index: 0, kind: input, shape index: {}]   ;;  %s3201_s1 = inlined_call_operand.hbm [shape: bf16[8,432], index: 1, kind: input, shape index: {}]   ;;  %s3202_s2 = inlined_call_operand.vmem [shape: f32[8,1], index: 2, kind: input, shape index: {}]   ;;  %s3203_s3 = inlined_call_operand.vmem [shape: f32[1,1152], index: 3, kind: input, shape index: {}]   ;;  %s3204_s4 = inlined_call_operand.hbm [shape: f32[2,8,1152], index: 4, kind: output, shape index: {0}]   ;;  %s3205_s5 = inlined_call_operand.vmem [shape: f32[2,3,8,2], index: 5, kind: output, shape index: {1}]  }
   0x1   :  { %3218 = sst [smem:[#allocation18_spill]] %s3201_s1 }
   0x2   :  { %3219 = sst [smem:[#allocation19_spill]] %s3204_s4 }
   0x3   :  { %3220 = sst [smem:[#allocation20_spill]] %s3205_s5 }
   0x4   :  { %11 = vsyncpa [#allocation4], 0 }
   0x5   :  { %13 = vsyncpa [#allocation4 + $0x1], 0 }
   0x6   :  { %14 = vsyncpa [#allocation7], 0 }
   0x7   :  { %15 = vsyncpa [#allocation5], 0 }
   0x8   :  { %17 = vsyncpa [#allocation5 + $0x1], 0  ;;  %s2668_s18 = smov 0   ;;  %s2670_s19 = smov 0  }
   0x9   :  { %s2672_s20 = smov 0   ;;  %s2674_s21 = smov 0  }
   0xa   :  { %s2676_s22 = smov 0   ;;  %s2678_s23 = smov 0  }
   0xb   :  { %s2680_s24 = smov 0   ;;  %s2682_s25 = smov 0  }
   0xc LB: > { %3221 = sst [smem:[#allocation12_spill]] %s2576_s18  ;;  %s2170_s26 = sadd.s32 4294967295, %s2604_s25   ;;  %s2604_s25 = sphi %s2682_s25, %s23_s25   ;;  %s2600_s24 = sphi %s2680_s24, %s3253_s24   ;;  %s2596_s23 = sphi %s2678_s23, %s3252_s23   ;;  %s2592_s22 = sphi %s2676_s22, %s3251_s22   ;;  %s2588_s21 = sphi %s2674_s21, %s3246_s21   ;;  %s2584_s20 = sphi %s2672_s20, %s3250_s20   ;;  %s2580_s19 = sphi %s2670_s19, %s3249_s19   ;;  %s2576_s18 = sphi %s2668_s18, %s3248_s18  }
   0xd   : > { %3222 = sst [smem:[#allocation13_spill]] %s2596_s23  ;;  %s2171_s27 = sadd.s32 4294967294, %s2604_s25  }
   0xe   : > { %3223 = sst [smem:[#allocation14_spill]] %s2604_s25  ;;  %p51_p0 = scmp.ne.s32.totalorder %s2584_s20, %s2580_s19 }
   0xf   : > { %p52_p1 = scmp.eq.s32.totalorder %s2604_s25, 0  ;;  %p57_p2 = scmp.ne.s32.totalorder %s2580_s19, %s2576_s18 }
  0x10   : > { %p2716_p3 = scmp.eq.s32.totalorder %s2170_s26, 0  ;;  %p151_p4 = scmp.eq.s32.totalorder %s2170_s26, 5 }
  0x11   : > { %p2720_p5 = por %p52_p1, %p51_p0  ;;  %p157_p6 = scmp.eq.s32.totalorder %s2171_s27, 5 }
  0x12   : > { %p2726_p7 = por %p2716_p3, %p57_p2  ;;  %p2730_p8 = por %p151_p4, %p51_p0 }
  0x13   : > { %p2734_p9 = por %p157_p6, %p57_p2  ;;  %p2172_p10 = scmp.ge.s32.totalorder %s2604_s25, 1 }
  0x14   : > { %s3226_s6 = scalar_select %p2726_p7, 1, 0 }
  0x15   : > { %s3227_s7 = scalar_select %p2730_p8, 1, 0 }
  0x16   : > { %s3229_s8 = scalar_select %p2734_p9, 1, 0 }
  0x17   : > { %3228 = sst [smem:[#allocation15_spill]] %s3227_s7  ;;  %p192_p11 = scmp.lt.s32.totalorder %s2604_s25, 7 }
  0x18   : > { %3230 = sst [smem:[#allocation16_spill]] %s3229_s8  ;;  %s2606_s10 = smov [#allocation6]  }
  0x19   : > { %p2740_p12 = pnand %p2172_p10, %p192_p11  ;;  %s205_s11 = sshll.u32 %s2606_s10, 4  ;;  %s206_s11 = int_to_ptr.vmem [resolvable:$true] %s205_s11 }
  0x1a   : > { %p2319_p13 = scmp.lt.s32.totalorder %s2604_s25, 6  ;;  %s32_s13 = sadd.s32 1, %s2596_s23 }
  0x1b   : > { %s3231_s9 = scalar_select %p2740_p12, 1, 0 }
  0x1c   : > { %p2306_p0 = pneg %p2740_p12  ;;  %p2749_p1 = pnand %p2319_p13, %p2720_p5 }
  0x1d   : > { %s2461_s14 = scalar_lea.vmem %s206_s11, 256  ;;  %p2469_p9 = scmp.lt.s32.totalorder %s206_s11, %s206_s11 }
  0x1e   : > { %p2307_p2 = pnand %p2306_p0, %p2716_p3  ;;  %p2462_p6 = scmp.ne.s32.totalorder %s206_s11, %s2461_s14 }
  0x1f   : > { %p2470_p8 = scmp.lt.s32.totalorder %s2461_s14, %s2461_s14 }
  0x20   : > { %p2452_p4 = pneg %p2307_p2 }
  0x21   : > { %p2471_p7 = por %p2470_p8, %p2469_p9 }
  0x22   : > { %p2464_p10 = pnand %p2462_p6, %p2452_p4 }
  0x24   : > { %p2465_p11 = pneg %p2464_p10 }
  0x26   : > { %p2472_p12 = pnand %p2471_p7, %p2465_p11 }
  0x28   : > { %2475 = shalt.err (!%p2472_p12)
}
  0x29   : > { %s3233_s1 = sld [smem:[#allocation18_spill]]  ;;  %p33_p5 = scmp.ge.s32.totalorder %s32_s13, 3 }
  0x2a   : > { %s35_s17 = sadd.s32 1, %s2600_s24  ;;  %s219_s26 = sand.u32 1, %s2584_s20  }
  0x2b   : > { %s2292_s27 = smul.u32 10, %s2596_s23  ;;  %s3255_s13 = smov (%p33_p5, %s32_s13), 0 }
  0x2c   : > { %3234 = sst [smem:[#allocation17_spill]] %s3255_s13  ;;  %s3257_s17 = smov (!%p33_p5, %s35_s17), %s2600_s24 }
  0x2d   : > { %s40_s30 = ssub.s32 %s2596_s23, %s3255_s13  ;;  %p37_p7 = scmp.ge.s32.totalorder %s3257_s17, 2 }
  0x2e   : > { %s2291_s10 = smul.u32 40, %s219_s26  ;;  %s3235_s13 = sadd.s32 1, %s2584_s20 }
  0x2f   : > { %2309 = dma.hbm_to_vmem [thread:$0]  (!%p2307_p2), %s3233_s1, 256, %s206_s11, [#allocation7]  }
  0x30   : > { %s2293_s14 = smul.u32 30, %s2600_s24  ;;  %s3259_s17 = smov (%p37_p7, %s3257_s17), 0 }
  0x31   : > { %s39_s11 = ssub.s32 %s2600_s24, %s3259_s17  ;;  %s223_s25 = scalar_lea.vmem [#allocation3], %s2291_s10 }
  0x32   : > { %s229_s15 = sadd.s32 %s2293_s14, %s2292_s27  ;;  %s41_s28 = sor.u32 %s40_s30, %s39_s11 }
  0x33   : > { %s2175_s16 = sshll.u32 %s229_s15, 6  ;;  %p42_p8 = scmp.eq.s32.totalorder %s41_s28, 0 }
  0x34   : > { %s231_s18 = scalar_lea.hbm %s3200_s0, %s2175_s16  ;;  %s232_s5 = sshll.u32 %s223_s25, 4  ;;  %s233_s5 = int_to_ptr.vmem [resolvable:$true] %s232_s5 }
  0x35   : > { %s2778_s23 = scalar_select %p42_p8, %s2584_s20, %s3235_s13  }
  0x36   : > { %s220_s4 = scalar_lea.sflag [#allocation4], %s219_s26  ;;  %p2478_p9 = pneg %p2749_p1 }
  0x37   : > { %s2489_s7 = scalar_lea.vmem %s233_s5, 640  ;;  %s2607_s27 = smov [#allocation3]  }
  0x38   : > { %p2490_p12 = scmp.ne.s32.totalorder %s233_s5, %s2489_s7  ;;  %s2494_s30 = sshll.u32 %s2607_s27, 4  ;;  %s2495_s30 = int_to_ptr.vmem [resolvable:$false] %s2494_s30 }
  0x39   : > { %s2496_s14 = scalar_lea.vmem %s2495_s30, 1280  ;;  %p2497_p2 = scmp.lt.s32.totalorder %s233_s5, %s2495_s30 }
  0x3a   : > { %p2492_p13 = pnand %p2490_p12, %p2478_p9  ;;  %p2498_p4 = scmp.lt.s32.totalorder %s2496_s14, %s2489_s7 }
  0x3c   : > { %p2493_p0 = pneg %p2492_p13  ;;  %p2499_p6 = por %p2498_p4, %p2497_p2 }
  0x3e   : > { %p2500_p10 = pnand %p2499_p6, %p2493_p0 }
  0x40   : > { %2503 = shalt.err (!%p2500_p10)
}
  0x41   : > { %s2608_s1 = smov 320   ;;  %s2609_s25 = smov 20  }
  0x42   : > { %2313 = dma.hbm_to_vmem [thread:$0]  (!%p2749_p1), %s231_s18, 640, %s233_s5, %s220_s4, %s2608_s1, %s2608_s1, %s2609_s25  }
  0x43   : > { %p3236_p11 = scmp.ne.s32.totalorder %s3231_s9, 0 }
  0x44   : > { %s2787_s28 = sand.u32 (!%p3236_p11), 1, %s2580_s19   ;;  %p3237_p5 = scmp.ne.s32.totalorder (!%p3236_p11), %s3226_s6, 0 }
  0x45   : > { %252 = sbr.rel (%p3236_p11) target bundleno = 785 (0x311), region = 36  ;;  %s255_s13 = scalar_lea.sflag (!%p3236_p11), [#allocation4], %s2787_s28 }
  0x46   : > { %s2294_s8 = smul.u32 (!%p3236_p11), 40, %s2787_s28 }
  0x48   : > { %s2791_s7 = scalar_lea.vmem (!%p3236_p11), [#allocation3], %s2294_s8 }
  0x4a   : > { %2563 = dma.done.wait (%p3237_p5), %s255_s13, 640  }
  0x4b   : > { %2565 = vsyncadd (%p3237_p5), %s255_s13, 4294966656 }
  0x4c   : > { %2567 = dma.done.wait (%p2716_p3), [#allocation7], 256  }
  0x4d   : > { %2569 = vsyncadd (%p2716_p3), [#allocation7], 4294967040  ;;  %v2802_v0 = vld [vmem:[%s2791_s7 + $0x14] sm:$0xff]  ;;  %v2805_v1 = vld [vmem:[%s2791_s7] sm:$0xff]  ;;  %s2610_s4 = smov 107   ;;  %s2611_s5 = smov 108  }
  0x4e   : > { %547 = vrot.lane.b32.xlu1 %v2802_v0, %s2610_s4  ;;  %543 = vrot.lane.b32.xlu0 %v2805_v1, %s2610_s4  ;;  %v2810_v2 = vld [vmem:[%s2791_s7 + $0x1c] sm:$0xff]  ;;  %v2813_v3 = vld [vmem:[%s2791_s7 + $0x8] sm:$0xff]  ;;  %s2612_s18 = smov 116   ;;  %s2613_s29 = smov 117   ;;  %vm344_vm0 = vcmask 1043456   ;;  %vm556_vm1 = vcmask 875520  }
  0x4f   : > { %s2614_s6 = smov 118   ;;  %s2615_s9 = smov 126   ;;  %v2842_v4 = vld [vmem:[%s2791_s7 + $0xc] sm:$0xff]  ;;  %v2845_v5 = vld [vmem:[%s2791_s7 + $0x4] sm:$0xff]  ;;  %v2853_v7 = vld [vmem:[%s2791_s7 + $0x18] sm:$0xff]  ;;  %vm521_vm2 = vcmask 883712  }
  0x50   : > { %s2616_s12 = smov 127   ;;  %s2617_s26 = smov 44   ;;  %v2850_v6 = vld [vmem:[%s2791_s7 + $0x20] sm:$0xff]  ;;  %vm486_vm3 = vcmask 949248   ;;  %vm451_vm4 = vcmask 957440   ;;  %vm416_vm5 = vcmask 965632  }
  0x51   : > { %s2618_s10 = smov 45   ;;  %s2619_s15 = smov 8   ;;  %vm381_vm6 = vcmask 1031168   ;;  %vm346_vm7 = vcmask 1039360   ;;  %vm1116_vm8 = vcmask 359424   ;;  %vm1081_vm9 = vcmask 367616  }
  0x52   : > { %549 = vrot.lane.b32.xlu1 %v2810_v2, %s2610_s4  ;;  %545 = vrot.lane.b32.xlu0 %v2813_v3, %s2610_s4  ;;  %s2620_s11 = smov 46   ;;  %s2621_s16 = smov 16   ;;  %vm836_vm10 = vcmask 64512   ;;  %vm1046_vm11 = vcmask 375808   ;;  %vm1796_vm12 = vcmask 392192   ;;  %vm801_vm13 = vcmask 130048  }
  0x53   : > { %s2622_s27 = smov 54   ;;  %s2623_s30 = smov 17   ;;  %vm1011_vm14 = vcmask 441344   ;;  %vm766_vm15 = vcmask 138240  }
  0x54   : > { %s2624_s14 = smov 55   ;;  %s2625_s1 = smov 18  }
  0x55   : > { %s2626_s25 = smov 56   ;;  %s2627_s8 = smov 26  }
  0x56   : > { %510 = vrot.lane.b32.xlu1 %v2813_v3, %s2611_s5  ;;  %508 = vrot.lane.b32.xlu0 %v2805_v1, %s2611_s5  ;;  %s2628_s13 = smov 6   ;;  %s2629_s4 = smov 27  }
  0x5a   : > { %514 = vrot.lane.b32.xlu1 %v2810_v2, %s2611_s5  ;;  %512 = vrot.lane.b32.xlu0 %v2802_v0, %s2611_s5  ;;  %s2630_s5 = smov 7  }
  0x5e   : > { %475 = vrot.lane.b32.xlu1 %v2813_v3, %s2612_s18  ;;  %473 = vrot.lane.b32.xlu0 %v2805_v1, %s2612_s18 }
  0x62   : > { %479 = vrot.lane.b32.xlu1 %v2810_v2, %s2612_s18  ;;  %477 = vrot.lane.b32.xlu0 %v2802_v0, %s2612_s18  ;;  %s2631_s18 = smov 28  }
  0x66   : > { %440 = vrot.lane.b32.xlu1 %v2813_v3, %s2613_s29  ;;  %438 = vrot.lane.b32.xlu0 %v2805_v1, %s2613_s29 }
  0x6a   : > { %444 = vrot.lane.b32.xlu1 %v2810_v2, %s2613_s29  ;;  %442 = vrot.lane.b32.xlu0 %v2802_v0, %s2613_s29  ;;  %s2632_s29 = smov 34  }
  0x6e   : > { %405 = vrot.lane.b32.xlu1 %v2813_v3, %s2614_s6  ;;  %403 = vrot.lane.b32.xlu0 %v2805_v1, %s2614_s6 }
  0x72   : > { %409 = vrot.lane.b32.xlu1 %v2810_v2, %s2614_s6  ;;  %407 = vrot.lane.b32.xlu0 %v2802_v0, %s2614_s6  ;;  %s2633_s6 = smov 106  }
  0x76   : > { %370 = vrot.lane.b32.xlu1 %v2813_v3, %s2615_s9  ;;  %368 = vrot.lane.b32.xlu0 %v2805_v1, %s2615_s9 }
  0x7a   : > { %374 = vrot.lane.b32.xlu1 %v2810_v2, %s2615_s9  ;;  %372 = vrot.lane.b32.xlu0 %v2802_v0, %s2615_s9  ;;  %s2635_s9 = smov 35  }
  0x7e   : > { %334 = vrot.lane.b32.xlu1 %v2813_v3, %s2616_s12  ;;  %332 = vrot.lane.b32.xlu0 %v2805_v1, %s2616_s12 }
  0x82   : > { %338 = vrot.lane.b32.xlu1 %v2810_v2, %s2616_s12  ;;  %336 = vrot.lane.b32.xlu0 %v2802_v0, %s2616_s12  ;;  %s2636_s12 = smov 36  }
  0x86   : > { %1105 = vrot.lane.b32.xlu1 %v2842_v4, %s2617_s26  ;;  %1103 = vrot.lane.b32.xlu0 %v2845_v5, %s2617_s26 }
  0x8a   : > { %1109 = vrot.lane.b32.xlu1 %v2850_v6, %s2617_s26  ;;  %1107 = vrot.lane.b32.xlu0 %v2853_v7, %s2617_s26 }
  0x8e   : > { %1070 = vrot.lane.b32.xlu1 %v2842_v4, %s2618_s10  ;;  %1068 = vrot.lane.b32.xlu0 %v2845_v5, %s2618_s10 }
  0x92   : > { %1074 = vrot.lane.b32.xlu1 %v2850_v6, %s2618_s10  ;;  %1072 = vrot.lane.b32.xlu0 %v2853_v7, %s2618_s10  ;;  %s2295_s10 = smul.u32 24, %s2787_s28 }
  0x96   : > { %825 = vrot.lane.b32.xlu1 %v2813_v3, %s2619_s15  ;;  %823 = vrot.lane.b32.xlu0 %v2805_v1, %s2619_s15 }
  0x9a   : > { %829 = vrot.lane.b32.xlu1 %v2810_v2, %s2619_s15  ;;  %827 = vrot.lane.b32.xlu0 %v2802_v0, %s2619_s15  ;;  %s3133_s15 = scalar_lea.vmem [#allocation8], %s2295_s10 }
  0x9e   : > { %1035 = vrot.lane.b32.xlu1 %v2842_v4, %s2620_s11  ;;  %1033 = vrot.lane.b32.xlu0 %v2845_v5, %s2620_s11 }
  0xa2   : > { %1039 = vrot.lane.b32.xlu1 %v2850_v6, %s2620_s11  ;;  %1037 = vrot.lane.b32.xlu0 %v2853_v7, %s2620_s11  ;;  %s3138_s11 = smul.u32 3, %s2588_s21 }
  0xa4   : > { %p302_p3 = scmp.lt.s32.totalorder %s3138_s11, 8 }
  0xa6   : > { %790 = vrot.lane.b32.xlu1 %v2813_v3, %s2621_s16  ;;  %788 = vrot.lane.b32.xlu0 %v2805_v1, %s2621_s16 }
  0xaa   : > { %794 = vrot.lane.b32.xlu1 %v2810_v2, %s2621_s16  ;;  %792 = vrot.lane.b32.xlu0 %v2802_v0, %s2621_s16  ;;  %s303_s16 = scalar_select %p302_p3, %s3138_s11, 8 }
  0xae   : > { %1000 = vrot.lane.b32.xlu1 %v2842_v4, %s2622_s27  ;;  %998 = vrot.lane.b32.xlu0 %v2845_v5, %s2622_s27 }
  0xb2   : > { %1004 = vrot.lane.b32.xlu1 %v2850_v6, %s2622_s27  ;;  %1002 = vrot.lane.b32.xlu0 %v2853_v7, %s2622_s27 }
  0xb6   : > { %755 = vrot.lane.b32.xlu1 %v2813_v3, %s2623_s30  ;;  %753 = vrot.lane.b32.xlu0 %v2805_v1, %s2623_s30 }
  0xba   : > { %759 = vrot.lane.b32.xlu1 %v2810_v2, %s2623_s30  ;;  %757 = vrot.lane.b32.xlu0 %v2802_v0, %s2623_s30 }
  0xbe   : > { %965 = vrot.lane.b32.xlu1 %v2842_v4, %s2624_s14  ;;  %963 = vrot.lane.b32.xlu0 %v2845_v5, %s2624_s14 }
  0xc0   : > { %v548_v8 = vpop.permute.xlu1 %547  ;;  %v544_v9 = vpop.permute.xlu0 %543 }
  0xc1   : > { %v553_v12 = vrot.slane %v548_v8, 4  ;;  %v551_v13 = vrot.slane %v544_v9, 4 }
  0xc2   : > { %969 = vrot.lane.b32.xlu1 %v2850_v6, %s2624_s14  ;;  %967 = vrot.lane.b32.xlu0 %v2853_v7, %s2624_s14  ;;  %s304_s14 = scalar_lea.vmem %s3203_s3, %s303_s16 }
  0xc4   : > { %v550_v10 = vpop.permute.xlu1 %549  ;;  %v546_v11 = vpop.permute.xlu0 %545 }
  0xc5   : > { %v554_v14 = vrot.slane %v550_v10, 4  ;;  %v552_v15 = vrot.slane %v546_v11, 4 }
  0xc6   : > { %720 = vrot.lane.b32.xlu1 %v2813_v3, %s2625_s1  ;;  %718 = vrot.lane.b32.xlu0 %v2805_v1, %s2625_s1 }
  0xc7   : > { %v559_v16 = vsel %vm344_vm0, %v553_v12, %v554_v14  ;;  %v561_v17 = vsel %vm556_vm1, %v550_v10, %v554_v14  ;;  %v555_v18 = vsel %vm344_vm0, %v551_v13, %v552_v15  ;;  %v558_v19 = vsel %vm556_vm1, %v546_v11, %v552_v15 }
  0xc8   : > { %v560_v20 = vsel %vm556_vm1, %v548_v8, %v559_v16  ;;  %569 = vst [vmem:[#allocation2 + $0xbc] sm:$0xf] %v561_v17  ;;  %v557_v21 = vsel %vm556_vm1, %v544_v9, %v555_v18  ;;  %567 = vst [vmem:[#allocation2 + $0xb0] sm:$0xf] %v558_v19  ;;  %v511_v22 = vpop.permute.xlu1 %510  ;;  %v509_v23 = vpop.permute.xlu0 %508  ;;  %vm976_vm1 = vcmask 449536  }
  0xc9   : > { %v517_v24 = vrot.slane %v511_v22, 4  ;;  %v516_v25 = vrot.slane %v509_v23, 4  ;;  %v2205_v26 = vcombine.high %v557_v21, %v560_v20  ;;  %v2204_v27 = vcombine.low %v557_v21, %v560_v20 }
  0xca   : > { %724 = vrot.lane.b32.xlu1 %v2810_v2, %s2625_s1  ;;  %722 = vrot.lane.b32.xlu0 %v2802_v0, %s2625_s1  ;;  %s3238_s1 = sld [smem:[#allocation15_spill]] }
  0xcb   : > { %v523_v28 = vsel %vm521_vm2, %v511_v22, %v517_v24  ;;  %v520_v29 = vsel %vm344_vm0, %v516_v25, %v517_v24  ;;  %1800 = vmatprep.subr.bf16.mxu0 %v2205_v26 }
  0xcc   : > { %532 = vst [vmem:[#allocation2 + $0x98] sm:$0xf] %v523_v28  ;;  %v522_v30 = vsel %vm521_vm2, %v509_v23, %v520_v29  ;;  %v515_v31 = vpop.permute.xlu1 %514  ;;  %v513_v32 = vpop.permute.xlu0 %512  ;;  %1801 = vmatpush1.bf16.msra.mxu0 %v2204_v27 }
  0xcd   : > { %v519_v33 = vrot.slane %v515_v31, 4  ;;  %v518_v34 = vrot.slane %v513_v32, 4 }
  0xce   : > { %930 = vrot.lane.b32.xlu1 %v2842_v4, %s2626_s25  ;;  %928 = vrot.lane.b32.xlu0 %v2845_v5, %s2626_s25 }
  0xcf   : > { %v526_v35 = vsel %vm521_vm2, %v515_v31, %v519_v33  ;;  %v524_v36 = vsel %vm344_vm0, %v518_v34, %v519_v33 }
  0xd0   : > { %534 = vst [vmem:[#allocation2 + $0xa4] sm:$0xf] %v526_v35  ;;  %v525_v37 = vsel %vm521_vm2, %v513_v32, %v524_v36  ;;  %v476_v38 = vpop.permute.xlu1 %475  ;;  %v474_v39 = vpop.permute.xlu0 %473  ;;  %vm731_vm2 = vcmask 146432   ;;  %p3240_p7 = scmp.ne.s32.totalorder %s3238_s1, 0 }
  0xd1   : > { %v482_v40 = vrot.slane %v476_v38, 4  ;;  %v481_v41 = vrot.slane %v474_v39, 4  ;;  %v2202_v42 = vcombine.high %v522_v30, %v525_v37  ;;  %v2201_v43 = vcombine.low %v522_v30, %v525_v37 }
  0xd2   : > { %934 = vrot.lane.b32.xlu1 %v2850_v6, %s2626_s25  ;;  %932 = vrot.lane.b32.xlu0 %v2853_v7, %s2626_s25  ;;  %s2297_s25 = smul.u32 9, %s2592_s22 }
  0xd3   : > { %v488_v44 = vsel %vm486_vm3, %v476_v38, %v482_v40  ;;  %v485_v45 = vsel %vm344_vm0, %v481_v41, %v482_v40  ;;  %1802 = vmatprep.subr.bf16.mxu0 %v2202_v42 }
  0xd4   : > { %497 = vst [vmem:[#allocation2 + $0x80] sm:$0xf] %v488_v44  ;;  %v487_v46 = vsel %vm486_vm3, %v474_v39, %v485_v45  ;;  %v480_v47 = vpop.permute.xlu1 %479  ;;  %v478_v48 = vpop.permute.xlu0 %477  ;;  %1803 = vmatpush1.bf16.msra.mxu0 %v2201_v43 }
  0xd5   : > { %v484_v49 = vrot.slane %v480_v47, 4  ;;  %v483_v50 = vrot.slane %v478_v48, 4 }
  0xd6   : > { %685 = vrot.lane.b32.xlu1 %v2813_v3, %s2627_s8  ;;  %683 = vrot.lane.b32.xlu0 %v2805_v1, %s2627_s8 }
  0xd7   : > { %v491_v51 = vsel %vm486_vm3, %v480_v47, %v484_v49  ;;  %v489_v52 = vsel %vm344_vm0, %v483_v50, %v484_v49 }
  0xd8   : > { %499 = vst [vmem:[#allocation2 + $0x8c] sm:$0xf] %v491_v51  ;;  %v490_v53 = vsel %vm486_vm3, %v478_v48, %v489_v52  ;;  %v441_v54 = vpop.permute.xlu1 %440  ;;  %v439_v55 = vpop.permute.xlu0 %438  ;;  %vm941_vm3 = vcmask 457728  }
  0xd9   : > { %v447_v56 = vrot.slane %v441_v54, 4  ;;  %v446_v57 = vrot.slane %v439_v55, 4  ;;  %v2199_v58 = vcombine.high %v487_v46, %v490_v53  ;;  %v2198_v59 = vcombine.low %v487_v46, %v490_v53 }
  0xda   : > { %689 = vrot.lane.b32.xlu1 %v2810_v2, %s2627_s8  ;;  %687 = vrot.lane.b32.xlu0 %v2802_v0, %s2627_s8  ;;  %s2021_s8 = sadd.s32 %s2297_s25, %s3138_s11 }
  0xdb   : > { %v453_v60 = vsel %vm451_vm4, %v441_v54, %v447_v56  ;;  %v450_v61 = vsel %vm344_vm0, %v446_v57, %v447_v56  ;;  %1804 = vmatprep.subr.bf16.mxu0 %v2199_v58 }
  0xdc   : > { %462 = vst [vmem:[#allocation2 + $0x68] sm:$0xf] %v453_v60  ;;  %v452_v62 = vsel %vm451_vm4, %v439_v55, %v450_v61  ;;  %v445_v63 = vpop.permute.xlu1 %444  ;;  %v443_v8 = vpop.permute.xlu0 %442  ;;  %1805 = vmatpush1.bf16.msra.mxu0 %v2198_v59 }
  0xdd   : > { %v449_v9 = vrot.slane %v445_v63, 4  ;;  %v448_v10 = vrot.slane %v443_v8, 4 }
  0xde   : > { %895 = vrot.lane.b32.xlu1 %v2813_v3, %s2628_s13  ;;  %893 = vrot.lane.b32.xlu0 %v2805_v1, %s2628_s13 }
  0xdf   : > { %v456_v11 = vsel %vm451_vm4, %v445_v63, %v449_v9  ;;  %v454_v12 = vsel %vm344_vm0, %v448_v10, %v449_v9 }
  0xe0   : > { %464 = vst [vmem:[#allocation2 + $0x74] sm:$0xf] %v456_v11  ;;  %v455_v13 = vsel %vm451_vm4, %v443_v8, %v454_v12  ;;  %v406_v14 = vpop.permute.xlu1 %405  ;;  %v404_v15 = vpop.permute.xlu0 %403  ;;  %v2184_v8 = vcombine.high %v2805_v1, %v2802_v0  ;;  %vm696_vm4 = vcmask 211968  }
  0xe1   : > { %v412_v16 = vrot.slane %v406_v14, 4  ;;  %v411_v17 = vrot.slane %v404_v15, 4  ;;  %v2196_v18 = vcombine.high %v452_v62, %v455_v13  ;;  %v2195_v19 = vcombine.low %v452_v62, %v455_v13 }
  0xe2   : > { %899 = vrot.lane.b32.xlu1 %v2810_v2, %s2628_s13  ;;  %897 = vrot.lane.b32.xlu0 %v2802_v0, %s2628_s13  ;;  %s2266_s13 = sshll.u32 %s2021_s8, 7 }
  0xe3   : > { %v418_v20 = vsel %vm416_vm5, %v406_v14, %v412_v16  ;;  %v415_v21 = vsel %vm344_vm0, %v411_v17, %v412_v16  ;;  %1806 = vmatprep.subr.bf16.mxu0 %v2196_v18  ;;  %v2183_v18 = vcombine.low %v2805_v1, %v2802_v0 }
  0xe4   : > { %427 = vst [vmem:[#allocation2 + $0x50] sm:$0xf] %v418_v20  ;;  %v417_v22 = vsel %vm416_vm5, %v404_v15, %v415_v21  ;;  %v410_v23 = vpop.permute.xlu1 %409  ;;  %v408_v24 = vpop.permute.xlu0 %407  ;;  %1807 = vmatpush1.bf16.msra.mxu0 %v2195_v19 }
  0xe5   : > { %v414_v25 = vrot.slane %v410_v23, 4  ;;  %v413_v26 = vrot.slane %v408_v24, 4 }
  0xe6   : > { %650 = vrot.lane.b32.xlu1 %v2813_v3, %s2629_s4  ;;  %648 = vrot.lane.b32.xlu0 %v2805_v1, %s2629_s4 }
  0xe7   : > { %v421_v27 = vsel %vm416_vm5, %v410_v23, %v414_v25  ;;  %v419_v28 = vsel %vm344_vm0, %v413_v26, %v414_v25 }
  0xe8   : > { %429 = vst [vmem:[#allocation2 + $0x5c] sm:$0xf] %v421_v27  ;;  %v420_v29 = vsel %vm416_vm5, %v408_v24, %v419_v28  ;;  %v371_v30 = vpop.permute.xlu1 %370  ;;  %v369_v31 = vpop.permute.xlu0 %368  ;;  %vm906_vm5 = vcmask 48128  }
  0xe9   : > { %v377_v32 = vrot.slane %v371_v30, 4  ;;  %v376_v33 = vrot.slane %v369_v31, 4  ;;  %v2193_v34 = vcombine.high %v417_v22, %v420_v29  ;;  %v2192_v35 = vcombine.low %v417_v22, %v420_v29 }
  0xea   : > { %654 = vrot.lane.b32.xlu1 %v2810_v2, %s2629_s4  ;;  %652 = vrot.lane.b32.xlu0 %v2802_v0, %s2629_s4  ;;  %s2025_s4 = sshll.u32 %s3133_s15, 4  ;;  %s2026_s4 = int_to_ptr.vmem [resolvable:$true] %s2025_s4 }
  0xeb   : > { %v383_v36 = vsel %vm381_vm6, %v371_v30, %v377_v32  ;;  %v380_v37 = vsel %vm344_vm0, %v376_v33, %v377_v32  ;;  %1808 = vmatprep.subr.bf16.mxu0 %v2193_v34 }
  0xec   : > { %392 = vst [vmem:[#allocation2 + $0x38] sm:$0xf] %v383_v36  ;;  %v382_v38 = vsel %vm381_vm6, %v369_v31, %v380_v37  ;;  %v375_v39 = vpop.permute.xlu1 %374  ;;  %v373_v40 = vpop.permute.xlu0 %372  ;;  %1809 = vmatpush1.bf16.msra.mxu0 %v2192_v35  ;;  %v2972_v35 = vld [vmem:[#allocation6] sm:$0xff] }
  0xed   : > { %v379_v41 = vrot.slane %v375_v39, 4  ;;  %v378_v42 = vrot.slane %v373_v40, 4 }
  0xee   : > { %860 = vrot.lane.b32.xlu1 %v2813_v3, %s2630_s5  ;;  %858 = vrot.lane.b32.xlu0 %v2805_v1, %s2630_s5 }
  0xef   : > { %v386_v43 = vsel %vm381_vm6, %v375_v39, %v379_v41  ;;  %v384_v44 = vsel %vm344_vm0, %v378_v42, %v379_v41  ;;  %v2634_v41 = vmov 0  }
  0xf0   : > { %394 = vst [vmem:[#allocation2 + $0x44] sm:$0xf] %v386_v43  ;;  %v385_v45 = vsel %vm381_vm6, %v373_v40, %v384_v44  ;;  %v335_v46 = vpop.permute.xlu1 %334  ;;  %v333_v47 = vpop.permute.xlu0 %332  ;;  %2416 = vset.pattern.permute.xlu0 %v2634_v41  ;;  %vm661_vm6 = vcmask 220160  }
  0xf1   : > { %v341_v48 = vrot.slane %v335_v46, 4  ;;  %v340_v49 = vrot.slane %v333_v47, 4  ;;  %v2190_v50 = vcombine.high %v382_v38, %v385_v45  ;;  %v2189_v51 = vcombine.low %v382_v38, %v385_v45 }
  0xf2   : > { %864 = vrot.lane.b32.xlu1 %v2810_v2, %s2630_s5  ;;  %862 = vrot.lane.b32.xlu0 %v2802_v0, %s2630_s5  ;;  %v2976_v38 = vcombine.high %v2972_v35, %v2972_v35 }
  0xf3   : > { %v348_v52 = vsel %vm346_vm7, %v335_v46, %v341_v48  ;;  %v345_v53 = vsel %vm344_vm0, %v340_v49, %v341_v48  ;;  %1810 = vmatprep.subr.bf16.mxu0 %v2190_v50 }
  0xf4   : > { %357 = vst [vmem:[#allocation2 + $0x20] sm:$0xf] %v348_v52  ;;  %v347_v54 = vsel %vm346_vm7, %v333_v47, %v345_v53  ;;  %v339_v55 = vpop.permute.xlu1 %338  ;;  %v337_v56 = vpop.permute.xlu0 %336  ;;  %1811 = vmatpush1.bf16.msra.mxu0 %v2189_v51  ;;  %1832 = vmatprep.mubr.bf16.mxu0 %v2976_v38 }
  0xf5   : > { %v343_v57 = vrot.slane %v339_v55, 4  ;;  %v342_v58 = vrot.slane %v337_v56, 4 }
  0xf6   : > { %615 = vrot.lane.b32.xlu1 %v2813_v3, %s2631_s18  ;;  %613 = vrot.lane.b32.xlu0 %v2805_v1, %s2631_s18 }
  0xf7   : > { %v351_v59 = vsel %vm346_vm7, %v339_v55, %v343_v57  ;;  %v349_v60 = vsel %vm344_vm0, %v342_v58, %v343_v57 }
  0xf8   : > { %359 = vst [vmem:[#allocation2 + $0x2c] sm:$0xf] %v351_v59  ;;  %v350_v61 = vsel %vm346_vm7, %v337_v56, %v349_v60  ;;  %v1106_v62 = vpop.permute.xlu1 %1105  ;;  %v1104_v63 = vpop.permute.xlu0 %1103  ;;  %vm871_vm7 = vcmask 56320  }
  0xf9   : > { %v1112_v9 = vrot.slane %v1106_v62, 4  ;;  %v1111_v10 = vrot.slane %v1104_v63, 4  ;;  %v2187_v11 = vcombine.high %v347_v54, %v350_v61  ;;  %v2186_v12 = vcombine.low %v347_v54, %v350_v61 }
  0xfa   : > { %619 = vrot.lane.b32.xlu1 %v2810_v2, %s2631_s18  ;;  %617 = vrot.lane.b32.xlu0 %v2802_v0, %s2631_s18 }
  0xfb   : > { %v1118_v13 = vsel %vm1116_vm8, %v1106_v62, %v1112_v9  ;;  %v1115_v14 = vsel %vm344_vm0, %v1111_v10, %v1112_v9  ;;  %1812 = vmatprep.subr.bf16.mxu0 %v2187_v11 }
  0xfc   : > { %1127 = vst [vmem:[#allocation2 + $0x230] sm:$0xf] %v1118_v13  ;;  %v1117_v15 = vsel %vm1116_vm8, %v1104_v63, %v1115_v14  ;;  %v1110_v16 = vpop.permute.xlu1 %1109  ;;  %v1108_v17 = vpop.permute.xlu0 %1107  ;;  %1813 = vmatpush1.bf16.msra.mxu0 %v2186_v12  ;;  %v2999_v63 = vld [vmem:[#allocation6 + $0x8] sm:$0xff] }
  0xfd   : > { %v1114_v19 = vrot.slane %v1110_v16, 4  ;;  %v1113_v20 = vrot.slane %v1108_v17, 4  ;;  %1814 = vmatprep.subr.bf16.mxu0 %v2184_v8  ;;  %v3004_v11 = vcombine.high %v2999_v63, %v2999_v63 }
  0xfe   : > { %1210 = vrot.lane.b32.xlu1 %v2842_v4, %s2632_s29  ;;  %1208 = vrot.lane.b32.xlu0 %v2845_v5, %s2632_s29 }
  0xff   : > { %v1121_v21 = vsel %vm1116_vm8, %v1110_v16, %v1114_v19  ;;  %v1119_v22 = vsel %vm344_vm0, %v1113_v20, %v1114_v19  ;;  %2264 = vmatprep.mubr.msk.bf16.mxu1 %vm1796_vm12, %v3004_v11 }
 0x100   : > { %1129 = vst [vmem:[#allocation2 + $0x23c] sm:$0xf] %v1121_v21  ;;  %v1120_v23 = vsel %vm1116_vm8, %v1108_v17, %v1119_v22  ;;  %v1071_v24 = vpop.permute.xlu1 %1070  ;;  %v1069_v25 = vpop.permute.xlu0 %1068  ;;  %1815 = vmatpush1.bf16.msra.mxu0 %v2183_v18  ;;  %vm626_vm8 = vcmask 228352  }
 0x101   : > { %v1077_v26 = vrot.slane %v1071_v24, 4  ;;  %v1076_v27 = vrot.slane %v1069_v25, 4  ;;  %v2253_v28 = vcombine.high %v1117_v15, %v1120_v23  ;;  %v2252_v29 = vcombine.low %v1117_v15, %v1120_v23 }
 0x102   : > { %1214 = vrot.lane.b32.xlu1 %v2850_v6, %s2632_s29  ;;  %1212 = vrot.lane.b32.xlu0 %v2853_v7, %s2632_s29  ;;  %s3239_s29 = sld [smem:[#allocation19_spill]] }
 0x103   : > { %v1083_v30 = vsel %vm1081_vm9, %v1071_v24, %v1077_v26  ;;  %v1080_v31 = vsel %vm344_vm0, %v1076_v27, %v1077_v26  ;;  %1841 = vmatprep.subr.bf16.mxu1 %v2253_v28 }
 0x104   : > { %1092 = vst [vmem:[#allocation2 + $0x218] sm:$0xf] %v1083_v30  ;;  %v1082_v32 = vsel %vm1081_vm9, %v1069_v25, %v1080_v31  ;;  %v1075_v33 = vpop.permute.xlu1 %1074  ;;  %v1073_v34 = vpop.permute.xlu0 %1072  ;;  %1842 = vmatpush1.bf16.msra.mxu1 %v2252_v29 }
 0x105   : > { %v1079_v36 = vrot.slane %v1075_v33, 4  ;;  %v1078_v37 = vrot.slane %v1073_v34, 4 }
 0x106   : > { %580 = vrot.lane.b32.xlu1 %v2813_v3, %s2633_s6  ;;  %578 = vrot.lane.b32.xlu0 %v2805_v1, %s2633_s6 }
 0x107   : > { %v1086_v39 = vsel %vm1081_vm9, %v1075_v33, %v1079_v36  ;;  %v1084_v40 = vsel %vm344_vm0, %v1078_v37, %v1079_v36 }
 0x108   : > { %1094 = vst [vmem:[#allocation2 + $0x224] sm:$0xf] %v1086_v39  ;;  %v1085_v42 = vsel %vm1081_vm9, %v1073_v34, %v1084_v40  ;;  %v826_v43 = vpop.permute.xlu1 %825  ;;  %v824_v44 = vpop.permute.xlu0 %823  ;;  %vm1221_vm9 = vcmask 277504  }
 0x109   : > { %v832_v45 = vrot.slane %v826_v43, 4  ;;  %v831_v46 = vrot.slane %v824_v44, 4  ;;  %v2250_v3 = vcombine.high %v1082_v32, %v1085_v42  ;;  %v2249_v47 = vcombine.low %v1082_v32, %v1085_v42 }
 0x10a   : > { %584 = vrot.lane.b32.xlu1 %v2810_v2, %s2633_s6  ;;  %582 = vrot.lane.b32.xlu0 %v2802_v0, %s2633_s6  ;;  %s2023_s6 = scalar_lea.hbm %s3239_s29, %s2266_s13 }
 0x10b   : > { %v838_v1 = vsel %vm836_vm10, %v826_v43, %v832_v45  ;;  %v835_v48 = vsel %vm344_vm0, %v831_v46, %v832_v45  ;;  %1843 = vmatprep.subr.bf16.mxu1 %v2250_v3 }
 0x10c   : > { %847 = vst [vmem:[#allocation2 + $0x170] sm:$0xf] %v838_v1  ;;  %v837_v49 = vsel %vm836_vm10, %v824_v44, %v835_v48  ;;  %v830_v50 = vpop.permute.xlu1 %829  ;;  %v828_v51 = vpop.permute.xlu0 %827  ;;  %1844 = vmatpush1.bf16.msra.mxu1 %v2249_v47 }
 0x10d   : > { %v834_v52 = vrot.slane %v830_v50, 4  ;;  %v833_v53 = vrot.slane %v828_v51, 4 }
 0x10e   : > { %1175 = vrot.lane.b32.xlu1 %v2842_v4, %s2635_s9  ;;  %1173 = vrot.lane.b32.xlu0 %v2845_v5, %s2635_s9 }
 0x10f   : > { %v841_v0 = vsel %vm836_vm10, %v830_v50, %v834_v52  ;;  %v839_v2 = vsel %vm344_vm0, %v833_v53, %v834_v52  ;;  %v317_v52 = vld [vmem:[%s2791_s7 + $0x8] sm:$0xf]  ;;  %v319_v53 = vld [vmem:[%s2791_s7 + $0x1c] sm:$0xf]  ;;  %s2637_s7 = smov [#allocation8]  }
 0x110   : > { %849 = vst [vmem:[#allocation2 + $0x17c] sm:$0xf] %v841_v0  ;;  %v840_v54 = vsel %vm836_vm10, %v828_v51, %v839_v2  ;;  %v1036_v55 = vpop.permute.xlu1 %1035  ;;  %v1034_v56 = vpop.permute.xlu0 %1033  ;;  %321 = vst [vmem:[#allocation2 + $0x8] sm:$0xf] %v317_v52  ;;  %vm591_vm10 = vcmask 867328   ;;  %s2508_s26 = sshll.u32 %s2637_s7, 4  ;;  %s2509_s26 = int_to_ptr.vmem [resolvable:$false] %s2508_s26 }
 0x111   : > { %v1042_v57 = vrot.slane %v1036_v55, 4  ;;  %v1041_v58 = vrot.slane %v1034_v56, 4  ;;  %v2229_v59 = vcombine.high %v837_v49, %v840_v54  ;;  %v2228_v60 = vcombine.low %v837_v49, %v840_v54  ;;  %323 = vst [vmem:[#allocation2 + $0x14] sm:$0xf] %v319_v53  ;;  %s2510_s10 = scalar_lea.vmem %s2509_s26, 768  ;;  %p2511_p12 = scmp.lt.s32.totalorder %s2026_s4, %s2509_s26 }
 0x112   : > { %1179 = vrot.lane.b32.xlu1 %v2850_v6, %s2635_s9  ;;  %1177 = vrot.lane.b32.xlu0 %v2853_v7, %s2635_s9  ;;  %s2001_s9 = scalar_lea.sflag [#allocation5], %s2787_s28 }
 0x113   : > { %v1048_v61 = vsel %vm1046_vm11, %v1036_v55, %v1042_v57  ;;  %v1045_v62 = vsel %vm344_vm0, %v1041_v58, %v1042_v57  ;;  %1816 = vmatprep.subr.bf16.mxu0 %v2229_v59 }
 0x114   : > { %1057 = vst [vmem:[#allocation2 + $0x200] sm:$0xf] %v1048_v61  ;;  %v1047_v8 = vsel %vm1046_vm11, %v1034_v56, %v1045_v62  ;;  %v1040_v9 = vpop.permute.xlu1 %1039  ;;  %v1038_v10 = vpop.permute.xlu0 %1037  ;;  %1817 = vmatpush2.bf16.msra.mxu0 %v2228_v60 }
 0x115   : > { %v1044_v12 = vrot.slane %v1040_v9, 4  ;;  %v1043_v13 = vrot.slane %v1038_v10, 4 }
 0x116   : > { %1140 = vrot.lane.b32.xlu1 %v2842_v4, %s2636_s12  ;;  %1138 = vrot.lane.b32.xlu0 %v2845_v5, %s2636_s12 }
 0x117   : > { %v1051_v14 = vsel %vm1046_vm11, %v1040_v9, %v1044_v12  ;;  %v1049_v15 = vsel %vm344_vm0, %v1043_v13, %v1044_v12 }
 0x118   : > { %1059 = vst [vmem:[#allocation2 + $0x20c] sm:$0xf] %v1051_v14  ;;  %v1050_v16 = vsel %vm1046_vm11, %v1038_v10, %v1049_v15  ;;  %v791_v17 = vpop.permute.xlu1 %790  ;;  %v789_v18 = vpop.permute.xlu0 %788  ;;  %vm1186_vm11 = vcmask 285696  }
 0x119   : > { %v797_v19 = vrot.slane %v791_v17, 4  ;;  %v796_v20 = vrot.slane %v789_v18, 4  ;;  %v2247_v21 = vcombine.high %v1047_v8, %v1050_v16  ;;  %v2246_v22 = vcombine.low %v1047_v8, %v1050_v16 }
 0x11a   : > { %1144 = vrot.lane.b32.xlu1 %v2850_v6, %s2636_s12  ;;  %1142 = vrot.lane.b32.xlu0 %v2853_v7, %s2636_s12  ;;  %s2504_s12 = scalar_lea.vmem %s2026_s4, 384 }
 0x11b   : > { %v803_v4 = vsel %vm801_vm13, %v791_v17, %v797_v19  ;;  %v800_v5 = vsel %vm344_vm0, %v796_v20, %v797_v19  ;;  %1845 = vmatprep.subr.bf16.mxu1 %v2247_v21  ;;  %p2505_p1 = scmp.ne.s32.totalorder %s2026_s4, %s2504_s12  ;;  %p2512_p13 = scmp.lt.s32.totalorder %s2510_s10, %s2504_s12 }
 0x11c   : > { %812 = vst [vmem:[#allocation2 + $0x158] sm:$0xf] %v803_v4  ;;  %v802_v23 = vsel %vm801_vm13, %v789_v18, %v800_v5  ;;  %v795_v24 = vpop.permute.xlu1 %794  ;;  %v793_v25 = vpop.permute.xlu0 %792  ;;  %1846 = vmatpush1.bf16.msra.mxu1 %v2246_v22  ;;  %v1345_v4 = vld [vmem:[%s3202_s2] sm:$0xff] }
 0x11d   : > { %v799_v26 = vrot.slane %v795_v24, 4  ;;  %v798_v27 = vrot.slane %v793_v25, 4  ;;  %p2506_p8 = pnand %p2505_p1, %p3240_p7  ;;  %p2513_p0 = por %p2512_p13, %p2511_p12 }
 0x11e   : > { %1348 = vperm.xlu0 %2416, %v1345_v4  }
 0x11f   : > { %v806_v28 = vsel %vm801_vm13, %v795_v24, %v799_v26  ;;  %v804_v29 = vsel %vm344_vm0, %v798_v27, %v799_v26  ;;  %p2507_p9 = pneg %p2506_p8 }
 0x120   : > { %814 = vst [vmem:[#allocation2 + $0x164] sm:$0xf] %v806_v28  ;;  %v805_v6 = vsel %vm801_vm13, %v793_v25, %v804_v29  ;;  %v1001_v7 = vpop.permute.xlu1 %1000  ;;  %v999_v30 = vpop.permute.xlu0 %998  ;;  %vm1151_vm13 = vcmask 293888  }
 0x121   : > { %v1007_v31 = vrot.slane %v1001_v7, 4  ;;  %v1006_v32 = vrot.slane %v999_v30, 4  ;;  %v2226_v33 = vcombine.high %v802_v23, %v805_v6  ;;  %v2225_v34 = vcombine.low %v802_v23, %v805_v6  ;;  %p2514_p2 = pnand %p2513_p0, %p2507_p9 }
 0x123   : > { %v1013_v36 = vsel %vm1011_vm14, %v1001_v7, %v1007_v31  ;;  %v1010_v37 = vsel %vm344_vm0, %v1006_v32, %v1007_v31  ;;  %1818 = vmatprep.subr.bf16.mxu0 %v2226_v33 }
 0x124   : > { %1022 = vst [vmem:[#allocation2 + $0x1e8] sm:$0xf] %v1013_v36  ;;  %v1012_v39 = vsel %vm1011_vm14, %v999_v30, %v1010_v37  ;;  %v1005_v40 = vpop.permute.xlu1 %1004  ;;  %v1003_v42 = vpop.permute.xlu0 %1002  ;;  %1819 = vmatpush2.bf16.msra.mxu0 %v2225_v34 }
 0x125   : > { %v1009_v43 = vrot.slane %v1005_v40, 4  ;;  %v1008_v44 = vrot.slane %v1003_v42, 4 }
 0x127   : > { %v1016_v45 = vsel %vm1011_vm14, %v1005_v40, %v1009_v43  ;;  %v1014_v46 = vsel %vm344_vm0, %v1008_v44, %v1009_v43 }
 0x128   : > { %1024 = vst [vmem:[#allocation2 + $0x1f4] sm:$0xf] %v1016_v45  ;;  %v1015_v3 = vsel %vm1011_vm14, %v1003_v42, %v1014_v46  ;;  %v756_v47 = vpop.permute.xlu1 %755  ;;  %v754_v1 = vpop.permute.xlu0 %753 }
 0x129   : > { %v762_v48 = vrot.slane %v756_v47, 4  ;;  %v761_v49 = vrot.slane %v754_v1, 4  ;;  %v2244_v50 = vcombine.high %v1012_v39, %v1015_v3  ;;  %v2243_v51 = vcombine.low %v1012_v39, %v1015_v3 }
 0x12b   : > { %v768_v0 = vsel %vm766_vm15, %v756_v47, %v762_v48  ;;  %v765_v2 = vsel %vm344_vm0, %v761_v49, %v762_v48  ;;  %1847 = vmatprep.subr.bf16.mxu1 %v2244_v50 }
 0x12c   : > { %777 = vst [vmem:[#allocation2 + $0x140] sm:$0xf] %v768_v0  ;;  %v767_v54 = vsel %vm766_vm15, %v754_v1, %v765_v2  ;;  %v760_v55 = vpop.permute.xlu1 %759  ;;  %v758_v56 = vpop.permute.xlu0 %757  ;;  %1848 = vmatpush1.bf16.msra.mxu1 %v2243_v51 }
 0x12d   : > { %v764_v57 = vrot.slane %v760_v55, 4  ;;  %v763_v58 = vrot.slane %v758_v56, 4 }
 0x12f   : > { %v771_v59 = vsel %vm766_vm15, %v760_v55, %v764_v57  ;;  %v769_v60 = vsel %vm344_vm0, %v763_v58, %v764_v57 }
 0x130   : > { %779 = vst [vmem:[#allocation2 + $0x14c] sm:$0xf] %v771_v59  ;;  %v770_v61 = vsel %vm766_vm15, %v758_v56, %v769_v60  ;;  %v966_v62 = vpop.permute.xlu1 %965  ;;  %v964_v8 = vpop.permute.xlu0 %963 }
 0x131   : > { %v972_v9 = vrot.slane %v966_v62, 4  ;;  %v971_v10 = vrot.slane %v964_v8, 4  ;;  %v2223_v12 = vcombine.high %v767_v54, %v770_v61  ;;  %v2222_v13 = vcombine.low %v767_v54, %v770_v61 }
 0x133   : > { %v978_v14 = vsel %vm976_vm1, %v966_v62, %v972_v9  ;;  %v975_v15 = vsel %vm344_vm0, %v971_v10, %v972_v9  ;;  %1820 = vmatprep.subr.bf16.mxu0 %v2223_v12 }
 0x134   : > { %987 = vst [vmem:[#allocation2 + $0x1d0] sm:$0xf] %v978_v14  ;;  %v977_v16 = vsel %vm976_vm1, %v964_v8, %v975_v15  ;;  %v970_v17 = vpop.permute.xlu1 %969  ;;  %v968_v18 = vpop.permute.xlu0 %967  ;;  %1821 = vmatpush2.bf16.msra.mxu0 %v2222_v13 }
 0x135   : > { %v974_v19 = vrot.slane %v970_v17, 4  ;;  %v973_v20 = vrot.slane %v968_v18, 4 }
 0x137   : > { %v981_v21 = vsel %vm976_vm1, %v970_v17, %v974_v19  ;;  %v979_v22 = vsel %vm344_vm0, %v973_v20, %v974_v19 }
 0x138   : > { %989 = vst [vmem:[#allocation2 + $0x1dc] sm:$0xf] %v981_v21  ;;  %v980_v5 = vsel %vm976_vm1, %v968_v18, %v979_v22  ;;  %v721_v23 = vpop.permute.xlu1 %720  ;;  %v719_v24 = vpop.permute.xlu0 %718 }
 0x139   : > { %v727_v25 = vrot.slane %v721_v23, 4  ;;  %v726_v26 = vrot.slane %v719_v24, 4  ;;  %v2241_v27 = vcombine.high %v977_v16, %v980_v5  ;;  %v2240_v28 = vcombine.low %v977_v16, %v980_v5 }
 0x13b   : > { %v733_v29 = vsel %vm731_vm2, %v721_v23, %v727_v25  ;;  %v730_v6 = vsel %vm344_vm0, %v726_v26, %v727_v25  ;;  %1849 = vmatprep.subr.bf16.mxu1 %v2241_v27 }
 0x13c   : > { %742 = vst [vmem:[#allocation2 + $0x128] sm:$0xf] %v733_v29  ;;  %v732_v7 = vsel %vm731_vm2, %v719_v24, %v730_v6  ;;  %v725_v30 = vpop.permute.xlu1 %724  ;;  %v723_v31 = vpop.permute.xlu0 %722  ;;  %1850 = vmatpush1.bf16.msra.mxu1 %v2240_v28 }
 0x13d   : > { %v729_v32 = vrot.slane %v725_v30, 4  ;;  %v728_v33 = vrot.slane %v723_v31, 4 }
 0x13f   : > { %v736_v34 = vsel %vm731_vm2, %v725_v30, %v729_v32  ;;  %v734_v36 = vsel %vm344_vm0, %v728_v33, %v729_v32 }
 0x140   : > { %744 = vst [vmem:[#allocation2 + $0x134] sm:$0xf] %v736_v34  ;;  %v735_v37 = vsel %vm731_vm2, %v723_v31, %v734_v36  ;;  %v931_v39 = vpop.permute.xlu1 %930  ;;  %v929_v40 = vpop.permute.xlu0 %928 }
 0x141   : > { %v937_v42 = vrot.slane %v931_v39, 4  ;;  %v936_v43 = vrot.slane %v929_v40, 4  ;;  %v2220_v44 = vcombine.high %v732_v7, %v735_v37  ;;  %v2219_v45 = vcombine.low %v732_v7, %v735_v37 }
 0x143   : > { %v943_v46 = vsel %vm941_vm3, %v931_v39, %v937_v42  ;;  %v940_v3 = vsel %vm344_vm0, %v936_v43, %v937_v42  ;;  %1822 = vmatprep.subr.bf16.mxu0 %v2220_v44 }
 0x144   : > { %952 = vst [vmem:[#allocation2 + $0x1b8] sm:$0xf] %v943_v46  ;;  %v942_v47 = vsel %vm941_vm3, %v929_v40, %v940_v3  ;;  %v935_v1 = vpop.permute.xlu1 %934  ;;  %v933_v48 = vpop.permute.xlu0 %932  ;;  %1823 = vmatpush2.bf16.msra.mxu0 %v2219_v45 }
 0x145   : > { %v939_v49 = vrot.slane %v935_v1, 4  ;;  %v938_v50 = vrot.slane %v933_v48, 4 }
 0x147   : > { %v946_v51 = vsel %vm941_vm3, %v935_v1, %v939_v49  ;;  %v944_v52 = vsel %vm344_vm0, %v938_v50, %v939_v49 }
 0x148   : > { %954 = vst [vmem:[#allocation2 + $0x1c4] sm:$0xf] %v946_v51  ;;  %v945_v53 = vsel %vm941_vm3, %v933_v48, %v944_v52  ;;  %v686_v0 = vpop.permute.xlu1 %685  ;;  %v684_v2 = vpop.permute.xlu0 %683 }
 0x149   : > { %v692_v54 = vrot.slane %v686_v0, 4  ;;  %v691_v55 = vrot.slane %v684_v2, 4  ;;  %v2238_v56 = vcombine.high %v942_v47, %v945_v53  ;;  %v2237_v57 = vcombine.low %v942_v47, %v945_v53 }
 0x14b   : > { %v698_v58 = vsel %vm696_vm4, %v686_v0, %v692_v54  ;;  %v695_v59 = vsel %vm344_vm0, %v691_v55, %v692_v54  ;;  %1851 = vmatprep.subr.bf16.mxu1 %v2238_v56 }
 0x14c   : > { %707 = vst [vmem:[#allocation2 + $0x110] sm:$0xf] %v698_v58  ;;  %v697_v60 = vsel %vm696_vm4, %v684_v2, %v695_v59  ;;  %v690_v61 = vpop.permute.xlu1 %689  ;;  %v688_v62 = vpop.permute.xlu0 %687  ;;  %1852 = vmatpush1.bf16.msra.mxu1 %v2237_v57 }
 0x14d   : > { %v694_v8 = vrot.slane %v690_v61, 4  ;;  %v693_v9 = vrot.slane %v688_v62, 4 }
 0x14f   : > { %v701_v10 = vsel %vm696_vm4, %v690_v61, %v694_v8  ;;  %v699_v12 = vsel %vm344_vm0, %v693_v9, %v694_v8 }
 0x150   : > { %709 = vst [vmem:[#allocation2 + $0x11c] sm:$0xf] %v701_v10  ;;  %v700_v13 = vsel %vm696_vm4, %v688_v62, %v699_v12  ;;  %v896_v14 = vpop.permute.xlu1 %895  ;;  %v894_v15 = vpop.permute.xlu0 %893 }
 0x151   : > { %v902_v16 = vrot.slane %v896_v14, 4  ;;  %v901_v17 = vrot.slane %v894_v15, 4  ;;  %v2217_v18 = vcombine.high %v697_v60, %v700_v13  ;;  %v2216_v19 = vcombine.low %v697_v60, %v700_v13 }
 0x153   : > { %v908_v20 = vsel %vm906_vm5, %v896_v14, %v902_v16  ;;  %v905_v21 = vsel %vm344_vm0, %v901_v17, %v902_v16  ;;  %1824 = vmatprep.subr.bf16.mxu0 %v2217_v18 }
 0x154   : > { %917 = vst [vmem:[#allocation2 + $0x1a0] sm:$0xf] %v908_v20  ;;  %v907_v22 = vsel %vm906_vm5, %v894_v15, %v905_v21  ;;  %v900_v4 = vpop.permute.xlu1 %899  ;;  %v898_v5 = vpop.permute.xlu0 %897  ;;  %1825 = vmatpush2.bf16.msra.mxu0 %v2216_v19 }
 0x155   : > { %v904_v23 = vrot.slane %v900_v4, 4  ;;  %v903_v24 = vrot.slane %v898_v5, 4 }
 0x157   : > { %v911_v25 = vsel %vm906_vm5, %v900_v4, %v904_v23  ;;  %v909_v26 = vsel %vm344_vm0, %v903_v24, %v904_v23 }
 0x158   : > { %919 = vst [vmem:[#allocation2 + $0x1ac] sm:$0xf] %v911_v25  ;;  %v910_v27 = vsel %vm906_vm5, %v898_v5, %v909_v26  ;;  %v651_v28 = vpop.permute.xlu1 %650  ;;  %v649_v29 = vpop.permute.xlu0 %648 }
 0x159   : > { %v657_v6 = vrot.slane %v651_v28, 4  ;;  %v656_v7 = vrot.slane %v649_v29, 4  ;;  %v2235_v30 = vcombine.high %v907_v22, %v910_v27  ;;  %v2234_v31 = vcombine.low %v907_v22, %v910_v27 }
 0x15b   : > { %v663_v32 = vsel %vm661_vm6, %v651_v28, %v657_v6  ;;  %v660_v33 = vsel %vm344_vm0, %v656_v7, %v657_v6  ;;  %1853 = vmatprep.subr.bf16.mxu1 %v2235_v30 }
 0x15c   : > { %672 = vst [vmem:[#allocation2 + $0xf8] sm:$0xf] %v663_v32  ;;  %v662_v34 = vsel %vm661_vm6, %v649_v29, %v660_v33  ;;  %v655_v36 = vpop.permute.xlu1 %654  ;;  %v653_v37 = vpop.permute.xlu0 %652  ;;  %1854 = vmatpush1.bf16.msra.mxu1 %v2234_v31 }
 0x15d   : > { %v659_v39 = vrot.slane %v655_v36, 4  ;;  %v658_v40 = vrot.slane %v653_v37, 4 }
 0x15f   : > { %v666_v42 = vsel %vm661_vm6, %v655_v36, %v659_v39  ;;  %v664_v43 = vsel %vm344_vm0, %v658_v40, %v659_v39 }
 0x160   : > { %674 = vst [vmem:[#allocation2 + $0x104] sm:$0xf] %v666_v42  ;;  %v665_v44 = vsel %vm661_vm6, %v653_v37, %v664_v43  ;;  %v861_v45 = vpop.permute.xlu1 %860  ;;  %v859_v46 = vpop.permute.xlu0 %858 }
 0x161   : > { %v867_v3 = vrot.slane %v861_v45, 4  ;;  %v866_v47 = vrot.slane %v859_v46, 4  ;;  %v2214_v1 = vcombine.high %v662_v34, %v665_v44  ;;  %v2213_v48 = vcombine.low %v662_v34, %v665_v44 }
 0x163   : > { %v873_v49 = vsel %vm871_vm7, %v861_v45, %v867_v3  ;;  %v870_v50 = vsel %vm344_vm0, %v866_v47, %v867_v3  ;;  %1826 = vmatprep.subr.bf16.mxu0 %v2214_v1 }
 0x164   : > { %882 = vst [vmem:[#allocation2 + $0x188] sm:$0xf] %v873_v49  ;;  %v872_v51 = vsel %vm871_vm7, %v859_v46, %v870_v50  ;;  %v865_v52 = vpop.permute.xlu1 %864  ;;  %v863_v53 = vpop.permute.xlu0 %862  ;;  %1827 = vmatpush2.bf16.msra.mxu0 %v2213_v48 }
 0x165   : > { %v869_v0 = vrot.slane %v865_v52, 4  ;;  %v868_v2 = vrot.slane %v863_v53, 4 }
 0x167   : > { %v876_v54 = vsel %vm871_vm7, %v865_v52, %v869_v0  ;;  %v874_v55 = vsel %vm344_vm0, %v868_v2, %v869_v0 }
 0x168   : > { %884 = vst [vmem:[#allocation2 + $0x194] sm:$0xf] %v876_v54  ;;  %v875_v56 = vsel %vm871_vm7, %v863_v53, %v874_v55  ;;  %v616_v57 = vpop.permute.xlu1 %615  ;;  %v614_v58 = vpop.permute.xlu0 %613  ;;  %v3102_v54 = vcombine.low %v2972_v35, %v2972_v35 }
 0x169   : > { %v622_v59 = vrot.slane %v616_v57, 4  ;;  %v621_v60 = vrot.slane %v614_v58, 4  ;;  %v2232_v61 = vcombine.high %v872_v51, %v875_v56  ;;  %v2231_v62 = vcombine.low %v872_v51, %v875_v56 }
 0x16b   : > { %v628_v8 = vsel %vm626_vm8, %v616_v57, %v622_v59  ;;  %v625_v9 = vsel %vm344_vm0, %v621_v60, %v622_v59  ;;  %1855 = vmatprep.subr.bf16.mxu1 %v2232_v61  ;;  %v2421_v60 = vld [vmem:[#allocation2 + $0x230] ss:$12 sps:$4 sm:$0xff]  }
 0x16c   : > { %637 = vst [vmem:[#allocation2 + $0xe0] sm:$0xf] %v628_v8  ;;  %v627_v10 = vsel %vm626_vm8, %v614_v58, %v625_v9  ;;  %v620_v12 = vpop.permute.xlu1 %619  ;;  %v618_v13 = vpop.permute.xlu0 %617  ;;  %1856 = vmatpush1.bf16.msra.mxu1 %v2231_v62 }
 0x16d   : > { %v624_v14 = vrot.slane %v620_v12, 4  ;;  %v623_v15 = vrot.slane %v618_v13, 4 }
 0x16f   : > { %v631_v16 = vsel %vm626_vm8, %v620_v12, %v624_v14  ;;  %v629_v17 = vsel %vm344_vm0, %v623_v15, %v624_v14  ;;  %v2422_v15 = vld [vmem:[#allocation2 + $0x218] ss:$12 sps:$4 sm:$0xff]  }
 0x170   : > { %639 = vst [vmem:[#allocation2 + $0xec] sm:$0xf] %v631_v16  ;;  %v630_v18 = vsel %vm626_vm8, %v618_v13, %v629_v17  ;;  %v1211_v19 = vpop.permute.xlu1 %1210  ;;  %v1209_v20 = vpop.permute.xlu0 %1208 }
 0x171   : > { %v1217_v21 = vrot.slane %v1211_v19, 4  ;;  %v1216_v22 = vrot.slane %v1209_v20, 4  ;;  %v2211_v4 = vcombine.high %v627_v10, %v630_v18  ;;  %v2210_v5 = vcombine.low %v627_v10, %v630_v18 }
 0x173   : > { %v1223_v23 = vsel %vm1221_vm9, %v1211_v19, %v1217_v21  ;;  %v1220_v24 = vsel %vm344_vm0, %v1216_v22, %v1217_v21  ;;  %1828 = vmatprep.subr.bf16.mxu0 %v2211_v4  ;;  %v2423_v22 = vld [vmem:[#allocation2 + $0x200] ss:$12 sps:$4 sm:$0xff]  }
 0x174   : > { %1232 = vst [vmem:[#allocation2 + $0x278] sm:$0xf] %v1223_v23  ;;  %v1222_v25 = vsel %vm1221_vm9, %v1209_v20, %v1220_v24  ;;  %v1215_v26 = vpop.permute.xlu1 %1214  ;;  %v1213_v27 = vpop.permute.xlu0 %1212  ;;  %1829 = vmatpush2.bf16.msra.mxu0 %v2210_v5 }
 0x175   : > { %v1219_v28 = vrot.slane %v1215_v26, 4  ;;  %v1218_v29 = vrot.slane %v1213_v27, 4 }
 0x177   : > { %v1226_v6 = vsel %vm1221_vm9, %v1215_v26, %v1219_v28  ;;  %v1224_v7 = vsel %vm344_vm0, %v1218_v29, %v1219_v28  ;;  %v2424_v26 = vld [vmem:[#allocation2 + $0x1e8] ss:$12 sps:$4 sm:$0xff]   ;;  %v2181_v28 = vcombine.low %v2999_v63, %v2999_v63  ;;  %v2428_v29 = vld [vmem:[#allocation2 + $0xb0] ss:$12 sps:$4 sm:$0xff]   ;;  %v2434_v63 = vld [vmem:[#allocation2 + $0x80] ss:$12 sps:$4 sm:$0xff]  }
 0x178   : > { %1234 = vst [vmem:[#allocation2 + $0x284] sm:$0xf] %v1226_v6  ;;  %v1225_v30 = vsel %vm1221_vm9, %v1213_v27, %v1224_v7  ;;  %v581_v31 = vpop.permute.xlu1 %580  ;;  %v579_v32 = vpop.permute.xlu0 %578  ;;  %v2425_v27 = vld [vmem:[#allocation2 + $0x170] ss:$12 sps:$4 sm:$0xff]   ;;  %v2430_v7 = vld [vmem:[#allocation2 + $0x158] ss:$12 sps:$4 sm:$0xff]  }
 0x179   : > { %v587_v33 = vrot.slane %v581_v31, 4  ;;  %v586_v34 = vrot.slane %v579_v32, 4  ;;  %v2262_v36 = vcombine.high %v1222_v25, %v1225_v30  ;;  %v2261_v37 = vcombine.low %v1222_v25, %v1225_v30  ;;  %v2429_v6 = vld [vmem:[#allocation2 + $0x1d0] ss:$12 sps:$4 sm:$0xff]   ;;  %v2431_v30 = vld [vmem:[#allocation2 + $0x98] ss:$12 sps:$4 sm:$0xff]  }
 0x17b   : > { %v593_v39 = vsel %vm591_vm10, %v581_v31, %v587_v33  ;;  %v590_v40 = vsel %vm344_vm0, %v586_v34, %v587_v33  ;;  %1867 = vmatprep.subr.bf16.mxu1 %v2262_v36  ;;  %v2432_v31 = vld [vmem:[#allocation2 + $0x1b8] ss:$12 sps:$4 sm:$0xff]   ;;  %v2435_v33 = vld [vmem:[#allocation2 + $0x1a0] ss:$12 sps:$4 sm:$0xff]   ;;  %v2436_v34 = vld [vmem:[#allocation2 + $0x128] ss:$12 sps:$4 sm:$0xff]  }
 0x17c   : > { %602 = vst [vmem:[#allocation2 + $0xc8] sm:$0xf] %v593_v39  ;;  %v592_v42 = vsel %vm591_vm10, %v579_v32, %v590_v40  ;;  %v585_v43 = vpop.permute.xlu1 %584  ;;  %v583_v44 = vpop.permute.xlu0 %582  ;;  %1868 = vmatpush2.bf16.msra.mxu1 %v2261_v37  ;;  %v2433_v32 = vld [vmem:[#allocation2 + $0x140] ss:$12 sps:$4 sm:$0xff]   ;;  %v2437_v36 = vld [vmem:[#allocation2 + $0x68] ss:$12 sps:$4 sm:$0xff]  }
 0x17d   : > { %v589_v45 = vrot.slane %v585_v43, 4  ;;  %v588_v46 = vrot.slane %v583_v44, 4  ;;  %v2438_v37 = vld [vmem:[#allocation2 + $0x188] ss:$12 sps:$4 sm:$0xff]   ;;  %v2439_v39 = vld [vmem:[#allocation2 + $0x110] ss:$12 sps:$4 sm:$0xff]  }
 0x17f   : > { %v596_v3 = vsel %vm591_vm10, %v585_v43, %v589_v45  ;;  %v594_v47 = vsel %vm344_vm0, %v588_v46, %v589_v45  ;;  %v2441_v40 = vld [vmem:[#allocation2 + $0x278] ss:$12 sps:$4 sm:$0xff]   ;;  %v2445_v45 = vld [vmem:[#allocation2 + $0xe0] ss:$12 sps:$4 sm:$0xff]  }
 0x180   : > { %604 = vst [vmem:[#allocation2 + $0xd4] sm:$0xf] %v596_v3  ;;  %v595_v1 = vsel %vm591_vm10, %v583_v44, %v594_v47  ;;  %v1176_v48 = vpop.permute.xlu1 %1175  ;;  %v1174_v49 = vpop.permute.xlu0 %1173  ;;  %v2443_v43 = vld [vmem:[#allocation2 + $0x38] ss:$12 sps:$4 sm:$0xff]   ;;  %v2446_v46 = vld [vmem:[#allocation2 + $0x20] ss:$12 sps:$4 sm:$0xff]  }
 0x181   : > { %v1182_v50 = vrot.slane %v1176_v48, 4  ;;  %v1181_v51 = vrot.slane %v1174_v49, 4  ;;  %v2208_v52 = vcombine.high %v592_v42, %v595_v1  ;;  %v2207_v53 = vcombine.low %v592_v42, %v595_v1  ;;  %v2442_v42 = vld [vmem:[#allocation2 + $0xf8] ss:$12 sps:$4 sm:$0xff]   ;;  %v2449_v1 = vld [vmem:[#allocation2 + $0x8] ss:$12 sps:$4 sm:$0xff]  }
 0x183   : > { %v1188_v0 = vsel %vm1186_vm11, %v1176_v48, %v1182_v50  ;;  %v1185_v2 = vsel %vm344_vm0, %v1181_v51, %v1182_v50  ;;  %1830 = vmatprep.subr.bf16.mxu0 %v2208_v52 }
 0x184   : > { %1197 = vst [vmem:[#allocation2 + $0x260] sm:$0xf] %v1188_v0  ;;  %v1187_v55 = vsel %vm1186_vm11, %v1174_v49, %v1185_v2  ;;  %v1180_v56 = vpop.permute.xlu1 %1179  ;;  %v1178_v57 = vpop.permute.xlu0 %1177  ;;  %1831 = vmatpush2.bf16.msra.mxu0 %v2207_v53 }
 0x185   : > { %v1184_v58 = vrot.slane %v1180_v56, 4  ;;  %v1183_v59 = vrot.slane %v1178_v57, 4  ;;  %1922 = vmatprep.subr.bf16.mxu0 %v2634_v41 }
 0x187   : > { %v1191_v61 = vsel %vm1186_vm11, %v1180_v56, %v1184_v58  ;;  %v1189_v62 = vsel %vm344_vm0, %v1183_v59, %v1184_v58  ;;  %1833 = vmatmul.mubr.bf16.vlgmr.msra.gmra.mxu0 %v3102_v54  ;;  %v2448_v47 = vld [vmem:[#allocation2 + $0xc8] ss:$12 sps:$4 sm:$0xff]   ;;  %v1964_v58 = vlaneseq }
 0x188   : > { %1199 = vst [vmem:[#allocation2 + $0x26c] sm:$0xf] %v1191_v61  ;;  %v1190_v35 = vsel %vm1186_vm11, %v1178_v57, %v1189_v62  ;;  %v1141_v8 = vpop.permute.xlu1 %1140  ;;  %v1139_v9 = vpop.permute.xlu0 %1138  ;;  %1923 = vmatpush1.bf16.msra.mxu0 %v2421_v60  ;;  %2265 = vmatprep.mubr.msk.bf16.mxu0 %vm1796_vm12, %v3004_v11 }
 0x189   : > { %v1147_v10 = vrot.slane %v1141_v8, 4  ;;  %v1146_v12 = vrot.slane %v1139_v9, 4  ;;  %v2259_v13 = vcombine.high %v1187_v55, %v1190_v35  ;;  %1924 = vmatprep.subr.bf16.mxu0 %v2634_v41  ;;  %v2258_v14 = vcombine.low %v1187_v55, %v1190_v35  ;;  %v1962_v35 = vld [vmem:[%s304_s14] sm:$0x7] }
 0x18a   : > { %v1965_v59 = vshrl.u32 %v1964_v58, 7 }
 0x18b   : > { %v1153_v16 = vsel %vm1151_vm13, %v1141_v8, %v1147_v10  ;;  %v1150_v17 = vsel %vm344_vm0, %v1146_v12, %v1147_v10  ;;  %1869 = vmatprep.subr.bf16.mxu1 %v2259_v13 }
 0x18c   : > { %1162 = vst [vmem:[#allocation2 + $0x248] sm:$0xf] %v1153_v16  ;;  %v1152_v18 = vsel %vm1151_vm13, %v1139_v9, %v1150_v17  ;;  %v1145_v19 = vpop.permute.xlu1 %1144  ;;  %v1143_v20 = vpop.permute.xlu0 %1142  ;;  %1870 = vmatpush2.bf16.msra.mxu1 %v2258_v14  ;;  %1925 = vmatpush1.bf16.msra.mxu0 %v2422_v15  ;;  %v1970_v60 = vsub.s32 1, %v1965_v59  ;;  %v1966_v62 = vsub.s32 0, %v1965_v59  ;;  %v1974_v14 = vsub.s32 2, %v1965_v59 }
 0x18d   : > { %v1149_v11 = vrot.slane %v1145_v19, 4  ;;  %v1148_v21 = vrot.slane %v1143_v20, 4  ;;  %1926 = vmatprep.subr.bf16.mxu0 %v2634_v41 }
 0x18e   : > { %v1971_v9 = vrot.slane %v1962_v35, %v1970_v60  ;;  %v1967_v13 = vrot.slane %v1962_v35, %v1966_v62 }
 0x18f   : > { %v1156_v4 = vsel %vm1151_vm13, %v1145_v19, %v1149_v11  ;;  %v1154_v5 = vsel %vm344_vm0, %v1148_v21, %v1149_v11  ;;  %v2444_v44 = vld [vmem:[#allocation2 + $0x260] ss:$12 sps:$4 sm:$0xff]   ;;  %v1975_v21 = vrot.slane %v1962_v35, %v1974_v14 }
 0x190   : > { %1164 = vst [vmem:[#allocation2 + $0x254] sm:$0xf] %v1156_v4  ;;  %v1155_v23 = vsel %vm1151_vm13, %v1143_v20, %v1154_v5  ;;  %1927 = vmatpush1.bf16.msra.mxu0 %v2423_v22 }
 0x191   : > { %v2256_v24 = vcombine.high %v1152_v18, %v1155_v23  ;;  %1928 = vmatprep.subr.bf16.mxu0 %v2634_v41  ;;  %v2255_v25 = vcombine.low %v1152_v18, %v1155_v23 }
 0x193   : > { %1871 = vmatprep.subr.bf16.mxu1 %v2256_v24 }
 0x194   : > { %1872 = vmatpush2.bf16.msra.mxu1 %v2255_v25  ;;  %1929 = vmatpush1.bf16.msra.mxu0 %v2424_v26 }
 0x195   : > { %2269 = vmatprep.subr.bf16.mxu1 %v2425_v27  ;;  %1930 = vmatprep.subr.bf16.mxu0 %v2634_v41 }
 0x197   : > { %1874 = vmatmul.mubr.bf16.vlgmr.msra.gmra.mxu1 %v2181_v28  ;;  %v2447_v3 = vld [vmem:[#allocation2 + $0x248] ss:$12 sps:$4 sm:$0xff]  }
 0x198   : > { %2270 = vmatpush3.bf16.msra.mxu1 %v2428_v29  ;;  %1931 = vmatpush1.bf16.msra.mxu0 %v2429_v6 }
 0x199   : > { %2271 = vmatprep.subr.bf16.mxu1 %v2430_v7  ;;  %1932 = vmatprep.subr.bf16.mxu0 %v2634_v41  ;;  %v1349_v52 = vpop.permute.xlu0 %1348 }
 0x19a   : > { %1914 = vmatprep.mubr.bf16.mxu1 %v2976_v38  ;;  %v2440_v38 = vld [vmem:[#allocation2 + $0x50] ss:$12 sps:$4 sm:$0xff]  }
 0x19c   : > { %2272 = vmatpush3.bf16.msra.mxu1 %v2431_v30  ;;  %1933 = vmatpush1.bf16.msra.mxu0 %v2432_v31 }
 0x19d   : > { %2273 = vmatprep.subr.bf16.mxu1 %v2433_v32  ;;  %1934 = vmatprep.subr.bf16.mxu0 %v2634_v41 }
 0x1a0   : > { %2274 = vmatpush3.bf16.msra.mxu1 %v2434_v63  ;;  %1935 = vmatpush1.bf16.msra.mxu0 %v2435_v33 }
 0x1a1   : > { %2275 = vmatprep.subr.bf16.mxu1 %v2436_v34  ;;  %1936 = vmatprep.subr.bf16.mxu0 %v2634_v41 }
 0x1a4   : > { %2276 = vmatpush3.bf16.msra.mxu1 %v2437_v36  ;;  %1937 = vmatpush1.bf16.msra.mxu0 %v2438_v37 }
 0x1a5   : > { %2277 = vmatprep.subr.bf16.mxu1 %v2439_v39  ;;  %1948 = vmatprep.subr.bf16.mxu0 %v2634_v41 }
 0x1a8   : > { %2278 = vmatpush3.bf16.msra.mxu1 %v2440_v38  ;;  %1949 = vmatpush2.bf16.msra.mxu0 %v2441_v40 }
 0x1a9   : > { %2279 = vmatprep.subr.bf16.mxu1 %v2442_v42  ;;  %1950 = vmatprep.subr.bf16.mxu0 %v2634_v41 }
 0x1ac   : > { %2280 = vmatpush3.bf16.msra.mxu1 %v2443_v43  ;;  %1951 = vmatpush2.bf16.msra.mxu0 %v2444_v44 }
 0x1ad   : > { %2281 = vmatprep.subr.bf16.mxu1 %v2445_v45  ;;  %1952 = vmatprep.subr.bf16.mxu0 %v2634_v41 }
 0x1b0   : > { %2282 = vmatpush3.bf16.msra.mxu1 %v2446_v46  ;;  %1953 = vmatpush2.bf16.msra.mxu0 %v2447_v3 }
 0x1b1   : > { %2283 = vmatprep.subr.bf16.mxu1 %v2448_v47 }
 0x1b3   : > { %1955 = vmatmul.mubr.bf16.vlgmr.msra.gmra.mxu0 %v2181_v28 }
 0x1b4   : > { %2284 = vmatpush3.bf16.msra.mxu1 %v2449_v1 }
 0x1b7   : > { %1915 = vmatmul.mubr.bf16.vlgmr.msra.gmra.mxu1 %v3102_v54 }
 0x247   : > { %v1834_v48 = vpop.f32.mrf.mxu0 }
 0x248   : > { %v1835_v41 = vadd.f32 %v1834_v48, %v1349_v52 }
 0x249   : > { %v1836_v49 = vpop.f32.mrf.mxu0 }
 0x24a   : > { %v1837_v2 = vadd.f32 %v1836_v49, %v1349_v52 }
 0x24b   : > { %v1838_v50 = vpop.f32.mrf.mxu0 }
 0x24d   : > { %v1839_v51 = vpop.f32.mrf.mxu0 }
 0x257   : > { %v1875_v53 = vpop.f32.mrf.mxu1 }
 0x258   : > { %v1876_v0 = vadd.f32 %v1875_v53, %v1835_v41 }
 0x259   : > { %v1877_v55 = vpop.f32.mrf.mxu1 }
 0x25a   : > { %1997 = vst [vmem:[%s3133_s15] sm:$0xff] %v1876_v0  ;;  %v1878_v56 = vadd.f32 %v1877_v55, %v1837_v2  ;;  %v1979_v20 = vmul.f32 %v1967_v13, %v1876_v0 }
 0x25b   : > { %v1879_v57 = vpop.f32.mrf.mxu1 }
 0x25c   : > { %1998 = vst [vmem:[%s3133_s15 + $0x8] sm:$0xff] %v1878_v56  ;;  %v1980_v17 = vmul.f32 %v1971_v9, %v1878_v56  ;;  %v1988_v23 = vmul.f32 %v1979_v20, %v1876_v0 }
 0x25d   : > { %v1880_v54 = vpop.f32.mrf.mxu1 }
 0x25e   : > { %v1989_v4 = vmul.f32 %v1980_v17, %v1878_v56  ;;  %v1982_v25 = vadd.f32 %v1980_v17, %v1979_v20 }
 0x260   : > { %v1991_v28 = vadd.f32 %v1989_v4, %v1988_v23 }
 0x273   : > { %v1956_v61 = vpop.f32.mrf.mxu0 }
 0x275   : > { %v1958_v8 = vpop.f32.mrf.mxu0 }
 0x277   : > { %v2285_v10 = vpop.f32.mrf.mxu1  ;;  %v1959_v12 = vpop.f32.mrf.mxu0 }
 0x279   : > { %v2286_v15 = vpop.f32.mrf.mxu1  ;;  %v1960_v16 = vpop.f32.mrf.mxu0 }
 0x27a   : > { %v2287_v18 = vadd.f32 %v2286_v15, %v2285_v10 }
 0x27b   : > { %v2288_v19 = vpop.f32.mrf.mxu1 }
 0x27c   : > { %v1917_v11 = vadd.f32 %v2287_v18, %v1349_v52 }
 0x27d   : > { %v2289_v22 = vpop.f32.mrf.mxu1 }
 0x27e   : > { %v1957_v5 = vadd.f32 %v1956_v61, %v1917_v11 }
 0x280   : > { %1999 = vst [vmem:[%s3133_s15 + $0x10] sm:$0xff] %v1957_v5  ;;  %v1981_v24 = vmul.f32 %v1975_v21, %v1957_v5 }
 0x282   : > { %v1983_v26 = vadd.f32 %v1982_v25, %v1981_v24  ;;  %v1990_v27 = vmul.f32 %v1981_v24, %v1957_v5 }
 0x284   : > { %1984 = vadd.xlane.f32.xlu1 %v1983_v26  ;;  %v1992_v29 = vadd.f32 %v1991_v28, %v1990_v27 }
 0x286   : > { %1993 = vadd.xlane.f32.xlu0 %v1992_v29 }
 0x287   : > { %2517 = shalt.err (!%p2514_p2)
}
 0x288   : > { %s2518_s15 = scalar_lea.hbm %s2023_s6, 384  ;;  %s2522_s16 = scalar_lea.hbm %s3239_s29, 2304 }
 0x289   : > { %p2519_p4 = scmp.ne.s32.totalorder %s2023_s6, %s2518_s15  ;;  %p2523_p11 = scmp.lt.s32.totalorder %s2023_s6, %s3239_s29 }
 0x28a   : > { %p2524_p5 = scmp.lt.s32.totalorder %s2522_s16, %s2518_s15 }
 0x28b   : > { %p2520_p6 = pnand %p2519_p4, %p3240_p7 }
 0x28c   : > { %p2525_p3 = por %p2524_p5, %p2523_p11 }
 0x28d   : > { %p2521_p10 = pneg %p2520_p6 }
 0x28f   : > { %p2526_p1 = pnand %p2525_p3, %p2521_p10 }
 0x291   : > { %2529 = shalt.err (!%p2526_p1)
}
 0x292   : > { %2304 = dma.vmem_to_hbm [thread:$0]  (%p3240_p7), %s2026_s4, 384, %s2023_s6, %s2001_s9   ;;  %vm1986_vm0 = vcmask 7168   ;;  %vm1995_vm12 = vcmask 15368  }
 0x293   : > { %p307_p8 = scmp.lt.s32.totalorder %s2592_s22, 1  ;;  %p309_p9 = scmp.lt.s32.totalorder %s2588_s21, 2 }
 0x294   : > { %s3241_s18 = sld [smem:[#allocation20_spill]] }
 0x295   : > { %s3261_s22 = smov (!%p307_p8, %s2592_s22), 1  ;;  %s3263_s21 = smov (!%p309_p9, %s2588_s21), 2 }
 0x296   : > { %s2296_s14 = smul.u32 3, %s3261_s22 }
 0x298   : > { %s312_s25 = sadd.s32 %s2296_s14, %s3263_s21 }
 0x299   : > { %s2178_s8 = sshll.u32 %s312_s25, 3 }
 0x29a   : > { %s314_s12 = scalar_lea.vmem %s3241_s18, %s2178_s8 }
 0x30d   : > { %v1985_v6 = vpop.xlane.xlu1 %1984 }
 0x30e   : > { %1987 = vst.msk [vmem:[%s314_s12] sm:$0xff] %vm1986_vm0, %v1985_v6 }
 0x30f   : > { %v1994_v7 = vpop.xlane.xlu0 %1993 }
 0x310   : > { %1996 = vst.msk [vmem:[%s314_s12] sm:$0xff] %vm1995_vm12, %v1994_v7 }
 0x311 PF: > { %s3242_s1 = sld [smem:[#allocation14_spill]] }
 0x312   : > { %s3243_s4 = sld [smem:[#allocation12_spill]] }
 0x313   : > { %s3244_s6 = sld [smem:[#allocation16_spill]] }
 0x317   : > { %p2321_p7 = scmp.ge.s32.totalorder %s3242_s1, 2 }
 0x318   : > { %s2040_s9 = sand.u32 1, %s3243_s4  }
 0x319   : > { %p3245_p12 = scmp.ne.s32.totalorder %s3244_s6, 0  ;;  %s2041_s21 = scalar_lea.sflag [#allocation5], %s2040_s9 }
 0x31b   : > { %p2315_p13 = pnand %p2321_p7, %p3245_p12 }
 0x31d   : > { %p2316_p0 = pneg %p2315_p13 }
 0x31f   : > { %2571 = dma.done.wait (%p2316_p0), %s2041_s21, 384  }
 0x320   : > { %2573 = vsyncadd (%p2316_p0), %s2041_s21, 4294966912  ;;  %s23_s25 = sadd.s32 1, %s3242_s1   ;;  %s3246_s21 = sld [smem:[#allocation13_spill]] }
 0x321   : > { %p20_p2 = scmp.ge.s32.totalorder %s23_s25, 8   ;;  %s3247_s7 = sld [smem:[#allocation17_spill]] }
 0x322   : > { %s3248_s18 = smov %s2580_s19  ;;  %s3249_s19 = smov %s2584_s20 }
 0x323   : > { %s3250_s20 = smov %s2778_s23  ;;  %s3251_s22 = smov %s2600_s24 }
 0x324   : > { %s3253_s24 = smov %s3259_s17  ;;  %22 = sbr.rel (!%p20_p2) target bundleno = 12 (0xc), region = 100 }
 0x327   : > { %s3252_s23 = smov %s3247_s7 }
 0x329   :  { %2057 = vsyncpa [#allocation4], 1 }
 0x32a   :  { %2059 = vsyncpa [#allocation4 + $0x1], 1 }
 0x32b   :  { %2060 = vsyncpa [#allocation7], 1 }
 0x32c   :  { %2061 = vsyncpa [#allocation5], 1 }
 0x32d   :  { %2063 = vsyncpa [#allocation5 + $0x1], 1 }

</bundles_post_ra>
